<compile_context>
chip_gen: v7x
topology: tpu7x:2x2x1
jax: 0.10.0
libtpu: 0.0.40
codegen_flags: <defaults>
</compile_context>

<pallas_src>
import functools

import jax
import jax.numpy as jnp
from jax.experimental import pallas as pl
from jax.experimental.pallas import tpu as pltpu


_VMEM = pl.BlockSpec(memory_space=pltpu.MemorySpace.VMEM)
_NEG = -1e30  # bias for padded output lanes; exp() underflows to exactly 0 in f32


# -----------------------------------------------------------------------------
# Pallas kernels
# -----------------------------------------------------------------------------
def _conv_pool_relu_kernel(p_ref, w_ref, b_ref, o_ref):
    """relu(maxpool2x2(conv(x) + b)) via one merged matmul + elementwise max.

    p_ref: [4*Mp, Kp] bf16   im2col patches, 4 pool-sub-position slabs of Mp rows each
                             (Mp is a multiple of 8, K zero-padded to Kp)
    w_ref: [Kp, 128]  bf16   conv weight, (kh, kw, Cin) rows, zero-padded rows/cols
    b_ref: [1, 128]   f32    conv bias (constant over the pool window -> added after max)
    o_ref: [Mp, 128]  bf16   pooled activation, lane-dense (first Cout lanes are real)
    """
    mp = o_ref.shape[0]
    r = jnp.dot(p_ref[...], w_ref[...], preferred_element_type=jnp.float32)  # [4*Mp,128]
    pooled = jnp.maximum(jnp.maximum(r[0 * mp:1 * mp], r[1 * mp:2 * mp]),
                         jnp.maximum(r[2 * mp:3 * mp], r[3 * mp:4 * mp]))
    o_ref[...] = jnp.maximum(pooled + b_ref[...], 0.0).astype(o_ref.dtype)


def _head_kernel(p2_ref, w2_ref, b2_ref, wfc1_ref, bfc1_ref, wfc2_ref, bfc2_ref,
                 o_ref, h2s_ref, *, n_spatial):
    """conv2+pool+relu -> fc1+relu -> fc2 -> log_softmax, fused in one kernel.

    p2_ref:  [4*Mp2, K2p] bf16  conv2 pool-grouped patches, rows ordered (s, b) per slab
    w2_ref:  [K2p, C2]    bf16  conv2 weight (zero-padded rows)
    b2_ref:  [1, C2]      f32
    wfc1_ref:[512, 128]   bf16  fc1 weight, rows in (s, c)-flat order, zero-padded
    bfc1_ref:[1, 128]     f32   fc1 bias (zero on padded lanes)
    wfc2_ref:[128, 128]   bf16  fc2 weight, zero-padded rows/cols
    bfc2_ref:[1, 128]     f32   fc2 bias, padded lanes = -1e30
    o_ref:   [B, 128]     f32   log-probs (first 10 lanes are real)
    h2s_ref: [B, 512]     f32   scratch: flattened conv2 activation in (s, c) order
    """
    batch = o_ref.shape[0]
    mp = p2_ref.shape[0] // 4
    c2 = w2_ref.shape[1]

    # conv2 + maxpool + relu (Dropout2d is identity in eval mode) — one merged matmul.
    r = jnp.dot(p2_ref[...], w2_ref[...], preferred_element_type=jnp.float32)  # [4*Mp2,C2]
    pooled = jnp.maximum(jnp.maximum(r[0 * mp:1 * mp], r[1 * mp:2 * mp]),
                         jnp.maximum(r[2 * mp:3 * mp], r[3 * mp:4 * mp]))
    h2 = jnp.maximum(pooled + b2_ref[...], 0.0)                 # [Mp2, C2] f32, rows (s,b)

    # Pack rows (s, b) into the fc1 input layout [B, 512], lane index = s*C2 + c.
    # Static, tiny stores; padded lanes (>= n_spatial*C2) stay exactly zero so the
    # zero-padded fc1 weight rows contribute nothing.
    h2s_ref[...] = jnp.zeros_like(h2s_ref)
    for s in range(n_spatial):
        h2s_ref[:, s * c2:(s + 1) * c2] = h2[s * batch:(s + 1) * batch, :]

    # fc1 + relu (Dropout = identity in eval): single K=512 bf16 matmul, f32 accumulate.
    h3 = jnp.maximum(
        jnp.dot(h2s_ref[...].astype(jnp.bfloat16), wfc1_ref[...],
                preferred_element_type=jnp.float32) + bfc1_ref[...], 0.0)      # [B, 128]

    # fc2 + log_softmax over the lane dim (padded lanes carry -1e30 bias -> exp == 0).
    logits = jnp.dot(h3.astype(jnp.bfloat16), wfc2_ref[...],
                     preferred_element_type=jnp.float32) + bfc2_ref[...]       # [B, 128]
    m = jnp.max(logits, axis=-1, keepdims=True)
    lse = jnp.log(jnp.sum(jnp.exp(logits - m), axis=-1, keepdims=True)) + m
    o_ref[...] = logits - lse


# -----------------------------------------------------------------------------
# pallas_call wrappers
# -----------------------------------------------------------------------------
def _nbytes(*arrays):
    return sum(int(a.size) * a.dtype.itemsize for a in arrays)


def _conv_pool_relu_call(p_merged, w, b):
    rows, kp = p_merged.shape
    mp = rows // 4
    n = w.shape[1]
    cost = pl.CostEstimate(
        flops=2 * rows * kp * n + 5 * mp * n,           # matmul + pool max + bias + relu
        transcendentals=0,
        bytes_accessed=_nbytes(p_merged, w, b) + mp * n * 2,
    )
    return pl.pallas_call(
        _conv_pool_relu_kernel,
        out_shape=jax.ShapeDtypeStruct((mp, n), jnp.bfloat16),
        in_specs=[_VMEM, _VMEM, _VMEM],
        out_specs=_VMEM,
        cost_estimate=cost,
    )(p_merged, w, b)


def _head_call(p2, w2, b2, w_fc1, b_fc1, w_fc2, b_fc2, batch, n_spatial):
    rows2, k2p = p2.shape
    mp2 = rows2 // 4
    c2 = w2.shape[1]
    k1, n1 = w_fc1.shape
    n_out = w_fc2.shape[1]
    cost = pl.CostEstimate(
        flops=(2 * rows2 * k2p * c2 + 5 * mp2 * c2              # conv2 + pool/bias/relu
               + 2 * batch * k1 * n1 + 2 * batch * n1           # fc1 + relu
               + 2 * batch * n1 * n_out + 4 * batch * n_out),   # fc2 + log_softmax ew
        transcendentals=batch * n_out + batch,                  # exp per logit + log per row
        bytes_accessed=_nbytes(p2, w2, b2, w_fc1, b_fc1, w_fc2, b_fc2) + batch * n_out * 4,
    )
    return pl.pallas_call(
        functools.partial(_head_kernel, n_spatial=n_spatial),
        out_shape=jax.ShapeDtypeStruct((batch, n_out), jnp.float32),
        in_specs=[_VMEM] * 7,
        out_specs=_VMEM,
        scratch_shapes=[pltpu.VMEM((batch, k1), jnp.float32)],
        cost_estimate=cost,
    )(p2, w2, b2, w_fc1, b_fc1, w_fc2, b_fc2)


# -----------------------------------------------------------------------------
# Glue: pool-grouped im2col (pure data movement, plain JAX)
# -----------------------------------------------------------------------------
def _pooled_patches(x, k, kpad, row_order):
    """Patches for a valid, stride-1, kxk conv followed by a 2x2/2 max pool.

    Returns the merged patch matrix [4*Mp, kpad] (bf16): 4 slabs, one per 2x2-pool
    sub-position, each with Mp = ceil(M/8)*8 rows (zero-padded). M = B*Po*Qo pooled
    output positions; rows ordered (b, io, jo) if row_order == "bhw" else (io, jo, b).
    Patch columns ordered (kh, kw, Cin), zero-padded to kpad.
    """
    bsz, h, w, c = x.shape
    ho, wo = h - k + 1, w - k + 1
    po, qo = ho // 2, wo // 2
    rows = []
    for di in range(k):
        cols = [x[:, di:di + ho, dj:dj + wo, :] for dj in range(k)]
        rows.append(jnp.stack(cols, axis=3))                  # [B, Ho, Wo, k, C]
    pat = jnp.stack(rows, axis=3)                             # [B, Ho, Wo, k, k, C]
    kk = k * k * c
    pat = pat.reshape(bsz, po, 2, qo, 2, kk)                  # split 2x2 pool windows
    if row_order == "bhw":
        pat = jnp.transpose(pat, (2, 4, 0, 1, 3, 5))          # [2, 2, B, Po, Qo, K]
    else:  # "hwb": spatial-major, batch-minor (what the fused head wants)
        pat = jnp.transpose(pat, (2, 4, 1, 3, 0, 5))          # [2, 2, Po, Qo, B, K]
    m = bsz * po * qo
    mp = ((m + 7) // 8) * 8                                   # sublane-aligned slab rows
    pat = pat.reshape(4, m, kk)
    pat = jnp.pad(pat, ((0, 0), (0, mp - m), (0, kpad - kk)))
    return pat.reshape(4 * mp, kpad), (bsz, po, qo, m, mp)


# -----------------------------------------------------------------------------
# Forward pass
# -----------------------------------------------------------------------------
@jax.jit
def svhn_classifier_forward(x_nchw, kp):
    """x_nchw: [B, 3, 32, 32] f32 -> log-probs [B, 10] f32."""
    x = jnp.transpose(x_nchw, (0, 2, 3, 1)).astype(jnp.bfloat16)      # NHWC, bf16 MXU operand

    # Stage 1: conv1 + maxpool + relu (lane-dense 128-wide output, rows ordered (b,io,jo)).
    p1, (bsz, po1, qo1, m1, _) = _pooled_patches(x, 5, 128, "bhw")    # [4*Mp1, 128]
    h1 = _conv_pool_relu_call(p1, kp["w1"], kp["b1"])                 # [Mp1, 128] bf16
    h1 = h1[:m1, :10].reshape(bsz, po1, qo1, 10)                      # [B, 14, 14, 10]

    # Stage 2 (fused head): conv2 + pool + relu + fc1 + relu + fc2 + log_softmax.
    p2, (_, po2, qo2, _, _) = _pooled_patches(h1, 5, 256, "hwb")      # [4*Mp2, 256]
    out = _head_call(p2, kp["w2"], kp["b2"], kp["w_fc1"], kp["b_fc1"],
                     kp["w_fc2"], kp["b_fc2"], batch=bsz,
                     n_spatial=po2 * qo2)                             # [B, 128]
    return out[:, :10]


# -----------------------------------------------------------------------------
# Parameters (deterministic, in-script, PyTorch layouts) + kernel-layout prep
# -----------------------------------------------------------------------------
def _init_torch_params(key):
    ks = jax.random.split(key, 8)

    def rnd(k, shape, fan_in):
        return jax.random.normal(k, shape, jnp.float32) / jnp.sqrt(fan_in)

    return {
        "conv1_w": rnd(ks[0], (10, 3, 5, 5), 75.0),
        "conv1_b": rnd(ks[1], (10,), 75.0),
        "conv2_w": rnd(ks[2], (20, 10, 5, 5), 250.0),
        "conv2_b": rnd(ks[3], (20,), 250.0),
        "fc1_w": rnd(ks[4], (50, 500), 500.0),
        "fc1_b": rnd(ks[5], (50,), 500.0),
        "fc2_w": rnd(ks[6], (10, 50), 50.0),
        "fc2_b": rnd(ks[7], (10,), 50.0),
    }


def _prepare_params(tp):
    """Reshape / pad PyTorch-layout params into the kernels' matmul layouts (bf16 MXU)."""
    # conv1: (kh, kw, cin) x cout, K padded 75 -> 128, N padded 10 -> 128 (lane-dense out).
    w1 = jnp.transpose(tp["conv1_w"], (2, 3, 1, 0)).reshape(75, 10)
    w1k = jnp.zeros((128, 128), jnp.float32).at[:75, :10].set(w1)
    b1k = jnp.zeros((1, 128), jnp.float32).at[0, :10].set(tp["conv1_b"])
    # conv2: K padded 250 -> 256.
    w2 = jnp.transpose(tp["conv2_w"], (2, 3, 1, 0)).reshape(250, 20)
    w2k = jnp.zeros((256, 20), jnp.float32).at[:250, :].set(w2)
    b2k = tp["conv2_b"].reshape(1, 20)
    # fc1: PyTorch's x.view(-1, 500) flattens NCHW [B, 20, 5, 5] as idx = c*25 + s.
    # Kernel packs the activation as idx = s*20 + c, so regroup rows; pad K 500 -> 512
    # and N 50 -> 128 with exact zeros.
    w_fc1 = tp["fc1_w"].T.reshape(20, 25, 50).transpose(1, 0, 2).reshape(500, 50)
    w_fc1k = jnp.zeros((512, 128), jnp.float32).at[:500, :50].set(w_fc1)
    b_fc1k = jnp.zeros((1, 128), jnp.float32).at[0, :50].set(tp["fc1_b"])
    # fc2: K padded 50 -> 128 (zero rows), N padded 10 -> 128 (zero cols, lane-dense
    # store); padded logits get a -1e30 bias so they contribute exp(.) == 0 inside
    # log_softmax. The pad columns MUST stay exactly zero (they do under bf16 cast).
    w_fc2k = jnp.zeros((128, 128), jnp.float32).at[:50, :10].set(tp["fc2_w"].T)
    b_fc2k = jnp.full((1, 128), _NEG, jnp.float32).at[0, :10].set(tp["fc2_b"])
    return {
        "w1": w1k.astype(jnp.bfloat16), "b1": b1k,
        "w2": w2k.astype(jnp.bfloat16), "b2": b2k,
        "w_fc1": w_fc1k.astype(jnp.bfloat16), "b_fc1": b_fc1k,
        "w_fc2": w_fc2k.astype(jnp.bfloat16), "b_fc2": b_fc2k,
    }


# -----------------------------------------------------------------------------
# Pure-JAX f32 reference (same math as the PyTorch module in eval mode)
# -----------------------------------------------------------------------------
def _reference_forward(x, tp):
    def conv(h, w, b):
        y = jax.lax.conv_general_dilated(
            h, w, window_strides=(1, 1), padding="VALID",
            dimension_numbers=("NCHW", "OIHW", "NCHW"))
        return y + b[None, :, None, None]

    def maxpool2(h):
        return jax.lax.reduce_window(h, -jnp.inf, jax.lax.max,
                                     (1, 1, 2, 2), (1, 1, 2, 2), "VALID")

    h = jax.nn.relu(maxpool2(conv(x, tp["conv1_w"], tp["conv1_b"])))
    h = jax.nn.relu(maxpool2(conv(h, tp["conv2_w"], tp["conv2_b"])))
    h = h.reshape(h.shape[0], -1)
    h = jax.nn.relu(h @ tp["fc1_w"].T + tp["fc1_b"])
    logits = h @ tp["fc2_w"].T + tp["fc2_b"]
    return jax.nn.log_softmax(logits, axis=-1)


# -----------------------------------------------------------------------------
if __name__ == "__main__":
    key = jax.random.PRNGKey(0)
    kx, kparam = jax.random.split(key)

    # SVHN-shaped input (32x32 required so that flatten gives 20*5*5 = 500).
    x = jax.random.normal(kx, (2, 3, 32, 32), jnp.float32)

    torch_params = _init_torch_params(kparam)
    kernel_params = _prepare_params(torch_params)

    out = svhn_classifier_forward(x, kernel_params)
    out = jax.block_until_ready(out)

    assert out.shape == (2, 10), out.shape
    assert out.dtype == jnp.float32
    # log_softmax rows must normalize.
    assert bool(jnp.allclose(jnp.sum(jnp.exp(out), axis=-1), 1.0, atol=1e-3))
    # Match the pure-JAX f32 reference (bf16 MXU operands -> loose tolerance).
    ref = _reference_forward(x, torch_params)
    max_err = float(jnp.max(jnp.abs(out - ref)))
    assert max_err < 0.1, max_err
    print("KERNEL_OK")
</pallas_src>

<mosaic_0001>
module attributes {stable_mosaic.version = 11 : i64} {
  func.func @_conv_pool_relu_kernel(%arg0: memref<1568x128xbf16, #tpu.memory_space<vmem>>, %arg1: memref<128x128xbf16, #tpu.memory_space<vmem>>, %arg2: memref<1x128xf32, #tpu.memory_space<vmem>>, %arg3: memref<392x128xbf16, #tpu.memory_space<vmem>>) attributes {dimension_semantics = [], scalar_prefetch = 0 : i64, scratch_operands = 0 : i64, tpu.core_type = #tpu.core_type<tc>} {
    %c0 = arith.constant 0 : index
    %c0_0 = arith.constant 0 : index
    %0 = vector.load %arg0[%c0, %c0_0] : memref<1568x128xbf16, #tpu.memory_space<vmem>>, vector<1568x128xbf16>
    %c0_1 = arith.constant 0 : index
    %c0_2 = arith.constant 0 : index
    %1 = vector.load %arg1[%c0_1, %c0_2] : memref<128x128xbf16, #tpu.memory_space<vmem>>, vector<128x128xbf16>
    %cst = arith.constant dense<0.000000e+00> : vector<1568x128xf32>
    %2 = tpu.matmul %0, %1, %cst {dimension_numbers = #tpu.dot_dimension_numbers<[1], [0], [0], [1], [0, 0, 1, 1], [], []>} : vector<1568x128xbf16>, vector<128x128xbf16>, vector<1568x128xf32> -> vector<1568x128xf32>
    %3 = vector.extract_strided_slice %2 {offsets = [0, 0], sizes = [392, 128], strides = [1, 1]} : vector<1568x128xf32> to vector<392x128xf32>
    %4 = vector.extract_strided_slice %2 {offsets = [392, 0], sizes = [392, 128], strides = [1, 1]} : vector<1568x128xf32> to vector<392x128xf32>
    %5 = arith.maximumf %3, %4 : vector<392x128xf32>
    %6 = vector.extract_strided_slice %2 {offsets = [784, 0], sizes = [392, 128], strides = [1, 1]} : vector<1568x128xf32> to vector<392x128xf32>
    %7 = vector.extract_strided_slice %2 {offsets = [1176, 0], sizes = [392, 128], strides = [1, 1]} : vector<1568x128xf32> to vector<392x128xf32>
    %8 = arith.maximumf %6, %7 : vector<392x128xf32>
    %9 = arith.maximumf %5, %8 : vector<392x128xf32>
    %c0_3 = arith.constant 0 : index
    %c0_4 = arith.constant 0 : index
    %10 = vector.load %arg2[%c0_3, %c0_4] : memref<1x128xf32, #tpu.memory_space<vmem>>, vector<1x128xf32>
    %11 = vector.broadcast %10 : vector<1x128xf32> to vector<392x128xf32>
    %12 = arith.addf %9, %11 : vector<392x128xf32>
    %cst_5 = arith.constant 0.000000e+00 : f32
    %13 = vector.broadcast %cst_5 : f32 to vector<392x128xf32>
    %14 = arith.maximumf %12, %13 : vector<392x128xf32>
    %15 = arith.truncf %14 : vector<392x128xf32> to vector<392x128xbf16>
    %c0_6 = arith.constant 0 : index
    %c0_7 = arith.constant 0 : index
    %16 = vector.load %arg3[%c0_6, %c0_7] : memref<392x128xbf16, #tpu.memory_space<vmem>>, vector<392x128xbf16>
    tpu.vector_store %arg3[%c0_6, %c0_7], %15 {strides = array<i32>} : memref<392x128xbf16, #tpu.memory_space<vmem>>, vector<392x128xbf16>,
    return
  }
}

module attributes {stable_mosaic.version = 11 : i64} {
  func.func @_head_kernel(%arg0: memref<224x256xbf16, #tpu.memory_space<vmem>>, %arg1: memref<256x20xbf16, #tpu.memory_space<vmem>>, %arg2: memref<1x20xf32, #tpu.memory_space<vmem>>, %arg3: memref<512x128xbf16, #tpu.memory_space<vmem>>, %arg4: memref<1x128xf32, #tpu.memory_space<vmem>>, %arg5: memref<128x128xbf16, #tpu.memory_space<vmem>>, %arg6: memref<1x128xf32, #tpu.memory_space<vmem>>, %arg7: memref<2x128xf32, #tpu.memory_space<vmem>>, %arg8: memref<2x512xf32, #tpu.memory_space<vmem>>) attributes {dimension_semantics = [], scalar_prefetch = 0 : i64, scratch_operands = 1 : i64, tpu.core_type = #tpu.core_type<tc>} {
    %c0 = arith.constant 0 : index
    %c0_0 = arith.constant 0 : index
    %0 = vector.load %arg0[%c0, %c0_0] : memref<224x256xbf16, #tpu.memory_space<vmem>>, vector<224x256xbf16>
    %c0_1 = arith.constant 0 : index
    %c0_2 = arith.constant 0 : index
    %1 = vector.load %arg1[%c0_1, %c0_2] : memref<256x20xbf16, #tpu.memory_space<vmem>>, vector<256x20xbf16>
    %cst = arith.constant dense<0.000000e+00> : vector<224x20xf32>
    %2 = tpu.matmul %0, %1, %cst {dimension_numbers = #tpu.dot_dimension_numbers<[1], [0], [0], [1], [0, 0, 1, 1], [], []>} : vector<224x256xbf16>, vector<256x20xbf16>, vector<224x20xf32> -> vector<224x20xf32>
    %3 = vector.extract_strided_slice %2 {offsets = [0, 0], sizes = [56, 20], strides = [1, 1]} : vector<224x20xf32> to vector<56x20xf32>
    %4 = vector.extract_strided_slice %2 {offsets = [56, 0], sizes = [56, 20], strides = [1, 1]} : vector<224x20xf32> to vector<56x20xf32>
    %5 = arith.maximumf %3, %4 : vector<56x20xf32>
    %6 = vector.extract_strided_slice %2 {offsets = [112, 0], sizes = [56, 20], strides = [1, 1]} : vector<224x20xf32> to vector<56x20xf32>
    %7 = vector.extract_strided_slice %2 {offsets = [168, 0], sizes = [56, 20], strides = [1, 1]} : vector<224x20xf32> to vector<56x20xf32>
    %8 = arith.maximumf %6, %7 : vector<56x20xf32>
    %9 = arith.maximumf %5, %8 : vector<56x20xf32>
    %c0_3 = arith.constant 0 : index
    %c0_4 = arith.constant 0 : index
    %10 = vector.load %arg2[%c0_3, %c0_4] : memref<1x20xf32, #tpu.memory_space<vmem>>, vector<1x20xf32>
    %11 = vector.broadcast %10 : vector<1x20xf32> to vector<56x20xf32>
    %12 = arith.addf %9, %11 : vector<56x20xf32>
    %cst_5 = arith.constant 0.000000e+00 : f32
    %13 = vector.broadcast %cst_5 : f32 to vector<56x20xf32>
    %14 = arith.maximumf %12, %13 : vector<56x20xf32>
    %cst_6 = arith.constant 0.000000e+00 : f32
    %15 = vector.broadcast %cst_6 : f32 to vector<2x512xf32>
    %c0_7 = arith.constant 0 : index
    %c0_8 = arith.constant 0 : index
    %16 = vector.load %arg8[%c0_7, %c0_8] : memref<2x512xf32, #tpu.memory_space<vmem>>, vector<2x512xf32>
    tpu.vector_store %arg8[%c0_7, %c0_8], %15 {strides = array<i32>} : memref<2x512xf32, #tpu.memory_space<vmem>>, vector<2x512xf32>,
    %17 = vector.extract_strided_slice %14 {offsets = [0, 0], sizes = [2, 20], strides = [1, 1]} : vector<56x20xf32> to vector<2x20xf32>
    %c0_9 = arith.constant 0 : index
    %c0_10 = arith.constant 0 : index
    %18 = vector.load %arg8[%c0_9, %c0_10] : memref<2x512xf32, #tpu.memory_space<vmem>>, vector<2x20xf32>
    tpu.vector_store %arg8[%c0_9, %c0_10], %17 {strides = array<i32>} : memref<2x512xf32, #tpu.memory_space<vmem>>, vector<2x20xf32>,
    %19 = vector.extract_strided_slice %14 {offsets = [2, 0], sizes = [2, 20], strides = [1, 1]} : vector<56x20xf32> to vector<2x20xf32>
    %c0_11 = arith.constant 0 : index
    %c20 = arith.constant 20 : index
    %20 = vector.load %arg8[%c0_11, %c20] : memref<2x512xf32, #tpu.memory_space<vmem>>, vector<2x20xf32>
    tpu.vector_store %arg8[%c0_11, %c20], %19 {strides = array<i32>} : memref<2x512xf32, #tpu.memory_space<vmem>>, vector<2x20xf32>,
    %21 = vector.extract_strided_slice %14 {offsets = [4, 0], sizes = [2, 20], strides = [1, 1]} : vector<56x20xf32> to vector<2x20xf32>
    %c0_12 = arith.constant 0 : index
    %c40 = arith.constant 40 : index
    %22 = vector.load %arg8[%c0_12, %c40] : memref<2x512xf32, #tpu.memory_space<vmem>>, vector<2x20xf32>
    tpu.vector_store %arg8[%c0_12, %c40], %21 {strides = array<i32>} : memref<2x512xf32, #tpu.memory_space<vmem>>, vector<2x20xf32>,
    %23 = vector.extract_strided_slice %14 {offsets = [6, 0], sizes = [2, 20], strides = [1, 1]} : vector<56x20xf32> to vector<2x20xf32>
    %c0_13 = arith.constant 0 : index
    %c60 = arith.constant 60 : index
    %24 = vector.load %arg8[%c0_13, %c60] : memref<2x512xf32, #tpu.memory_space<vmem>>, vector<2x20xf32>
    tpu.vector_store %arg8[%c0_13, %c60], %23 {strides = array<i32>} : memref<2x512xf32, #tpu.memory_space<vmem>>, vector<2x20xf32>,
    %25 = vector.extract_strided_slice %14 {offsets = [8, 0], sizes = [2, 20], strides = [1, 1]} : vector<56x20xf32> to vector<2x20xf32>
    %c0_14 = arith.constant 0 : index
    %c80 = arith.constant 80 : index
    %26 = vector.load %arg8[%c0_14, %c80] : memref<2x512xf32, #tpu.memory_space<vmem>>, vector<2x20xf32>
    tpu.vector_store %arg8[%c0_14, %c80], %25 {strides = array<i32>} : memref<2x512xf32, #tpu.memory_space<vmem>>, vector<2x20xf32>,
    %27 = vector.extract_strided_slice %14 {offsets = [10, 0], sizes = [2, 20], strides = [1, 1]} : vector<56x20xf32> to vector<2x20xf32>
    %c0_15 = arith.constant 0 : index
    %c100 = arith.constant 100 : index
    %28 = vector.load %arg8[%c0_15, %c100] : memref<2x512xf32, #tpu.memory_space<vmem>>, vector<2x20xf32>
    tpu.vector_store %arg8[%c0_15, %c100], %27 {strides = array<i32>} : memref<2x512xf32, #tpu.memory_space<vmem>>, vector<2x20xf32>,
    %29 = vector.extract_strided_slice %14 {offsets = [12, 0], sizes = [2, 20], strides = [1, 1]} : vector<56x20xf32> to vector<2x20xf32>
    %c0_16 = arith.constant 0 : index
    %c120 = arith.constant 120 : index
    %30 = vector.load %arg8[%c0_16, %c120] : memref<2x512xf32, #tpu.memory_space<vmem>>, vector<2x20xf32>
    tpu.vector_store %arg8[%c0_16, %c120], %29 {strides = array<i32>} : memref<2x512xf32, #tpu.memory_space<vmem>>, vector<2x20xf32>,
    %31 = vector.extract_strided_slice %14 {offsets = [14, 0], sizes = [2, 20], strides = [1, 1]} : vector<56x20xf32> to vector<2x20xf32>
    %c0_17 = arith.constant 0 : index
    %c140 = arith.constant 140 : index
    %32 = vector.load %arg8[%c0_17, %c140] : memref<2x512xf32, #tpu.memory_space<vmem>>, vector<2x20xf32>
    tpu.vector_store %arg8[%c0_17, %c140], %31 {strides = array<i32>} : memref<2x512xf32, #tpu.memory_space<vmem>>, vector<2x20xf32>,
    %33 = vector.extract_strided_slice %14 {offsets = [16, 0], sizes = [2, 20], strides = [1, 1]} : vector<56x20xf32> to vector<2x20xf32>
    %c0_18 = arith.constant 0 : index
    %c160 = arith.constant 160 : index
    %34 = vector.load %arg8[%c0_18, %c160] : memref<2x512xf32, #tpu.memory_space<vmem>>, vector<2x20xf32>
    tpu.vector_store %arg8[%c0_18, %c160], %33 {strides = array<i32>} : memref<2x512xf32, #tpu.memory_space<vmem>>, vector<2x20xf32>,
    %35 = vector.extract_strided_slice %14 {offsets = [18, 0], sizes = [2, 20], strides = [1, 1]} : vector<56x20xf32> to vector<2x20xf32>
    %c0_19 = arith.constant 0 : index
    %c180 = arith.constant 180 : index
    %36 = vector.load %arg8[%c0_19, %c180] : memref<2x512xf32, #tpu.memory_space<vmem>>, vector<2x20xf32>
    tpu.vector_store %arg8[%c0_19, %c180], %35 {strides = array<i32>} : memref<2x512xf32, #tpu.memory_space<vmem>>, vector<2x20xf32>,
    %37 = vector.extract_strided_slice %14 {offsets = [20, 0], sizes = [2, 20], strides = [1, 1]} : vector<56x20xf32> to vector<2x20xf32>
    %c0_20 = arith.constant 0 : index
    %c200 = arith.constant 200 : index
    %38 = vector.load %arg8[%c0_20, %c200] : memref<2x512xf32, #tpu.memory_space<vmem>>, vector<2x20xf32>
    tpu.vector_store %arg8[%c0_20, %c200], %37 {strides = array<i32>} : memref<2x512xf32, #tpu.memory_space<vmem>>, vector<2x20xf32>,
    %39 = vector.extract_strided_slice %14 {offsets = [22, 0], sizes = [2, 20], strides = [1, 1]} : vector<56x20xf32> to vector<2x20xf32>
    %c0_21 = arith.constant 0 : index
    %c220 = arith.constant 220 : index
    %40 = vector.load %arg8[%c0_21, %c220] : memref<2x512xf32, #tpu.memory_space<vmem>>, vector<2x20xf32>
    tpu.vector_store %arg8[%c0_21, %c220], %39 {strides = array<i32>} : memref<2x512xf32, #tpu.memory_space<vmem>>, vector<2x20xf32>,
    %41 = vector.extract_strided_slice %14 {offsets = [24, 0], sizes = [2, 20], strides = [1, 1]} : vector<56x20xf32> to vector<2x20xf32>
    %c0_22 = arith.constant 0 : index
    %c240 = arith.constant 240 : index
    %42 = vector.load %arg8[%c0_22, %c240] : memref<2x512xf32, #tpu.memory_space<vmem>>, vector<2x20xf32>
    tpu.vector_store %arg8[%c0_22, %c240], %41 {strides = array<i32>} : memref<2x512xf32, #tpu.memory_space<vmem>>, vector<2x20xf32>,
    %43 = vector.extract_strided_slice %14 {offsets = [26, 0], sizes = [2, 20], strides = [1, 1]} : vector<56x20xf32> to vector<2x20xf32>
    %c0_23 = arith.constant 0 : index
    %c260 = arith.constant 260 : index
    %44 = vector.load %arg8[%c0_23, %c260] : memref<2x512xf32, #tpu.memory_space<vmem>>, vector<2x20xf32>
    tpu.vector_store %arg8[%c0_23, %c260], %43 {strides = array<i32>} : memref<2x512xf32, #tpu.memory_space<vmem>>, vector<2x20xf32>,
    %45 = vector.extract_strided_slice %14 {offsets = [28, 0], sizes = [2, 20], strides = [1, 1]} : vector<56x20xf32> to vector<2x20xf32>
    %c0_24 = arith.constant 0 : index
    %c280 = arith.constant 280 : index
    %46 = vector.load %arg8[%c0_24, %c280] : memref<2x512xf32, #tpu.memory_space<vmem>>, vector<2x20xf32>
    tpu.vector_store %arg8[%c0_24, %c280], %45 {strides = array<i32>} : memref<2x512xf32, #tpu.memory_space<vmem>>, vector<2x20xf32>,
    %47 = vector.extract_strided_slice %14 {offsets = [30, 0], sizes = [2, 20], strides = [1, 1]} : vector<56x20xf32> to vector<2x20xf32>
    %c0_25 = arith.constant 0 : index
    %c300 = arith.constant 300 : index
    %48 = vector.load %arg8[%c0_25, %c300] : memref<2x512xf32, #tpu.memory_space<vmem>>, vector<2x20xf32>
    tpu.vector_store %arg8[%c0_25, %c300], %47 {strides = array<i32>} : memref<2x512xf32, #tpu.memory_space<vmem>>, vector<2x20xf32>,
    %49 = vector.extract_strided_slice %14 {offsets = [32, 0], sizes = [2, 20], strides = [1, 1]} : vector<56x20xf32> to vector<2x20xf32>
    %c0_26 = arith.constant 0 : index
    %c320 = arith.constant 320 : index
    %50 = vector.load %arg8[%c0_26, %c320] : memref<2x512xf32, #tpu.memory_space<vmem>>, vector<2x20xf32>
    tpu.vector_store %arg8[%c0_26, %c320], %49 {strides = array<i32>} : memref<2x512xf32, #tpu.memory_space<vmem>>, vector<2x20xf32>,
    %51 = vector.extract_strided_slice %14 {offsets = [34, 0], sizes = [2, 20], strides = [1, 1]} : vector<56x20xf32> to vector<2x20xf32>
    %c0_27 = arith.constant 0 : index
    %c340 = arith.constant 340 : index
    %52 = vector.load %arg8[%c0_27, %c340] : memref<2x512xf32, #tpu.memory_space<vmem>>, vector<2x20xf32>
    tpu.vector_store %arg8[%c0_27, %c340], %51 {strides = array<i32>} : memref<2x512xf32, #tpu.memory_space<vmem>>, vector<2x20xf32>,
    %53 = vector.extract_strided_slice %14 {offsets = [36, 0], sizes = [2, 20], strides = [1, 1]} : vector<56x20xf32> to vector<2x20xf32>
    %c0_28 = arith.constant 0 : index
    %c360 = arith.constant 360 : index
    %54 = vector.load %arg8[%c0_28, %c360] : memref<2x512xf32, #tpu.memory_space<vmem>>, vector<2x20xf32>
    tpu.vector_store %arg8[%c0_28, %c360], %53 {strides = array<i32>} : memref<2x512xf32, #tpu.memory_space<vmem>>, vector<2x20xf32>,
    %55 = vector.extract_strided_slice %14 {offsets = [38, 0], sizes = [2, 20], strides = [1, 1]} : vector<56x20xf32> to vector<2x20xf32>
    %c0_29 = arith.constant 0 : index
    %c380 = arith.constant 380 : index
    %56 = vector.load %arg8[%c0_29, %c380] : memref<2x512xf32, #tpu.memory_space<vmem>>, vector<2x20xf32>
    tpu.vector_store %arg8[%c0_29, %c380], %55 {strides = array<i32>} : memref<2x512xf32, #tpu.memory_space<vmem>>, vector<2x20xf32>,
    %57 = vector.extract_strided_slice %14 {offsets = [40, 0], sizes = [2, 20], strides = [1, 1]} : vector<56x20xf32> to vector<2x20xf32>
    %c0_30 = arith.constant 0 : index
    %c400 = arith.constant 400 : index
    %58 = vector.load %arg8[%c0_30, %c400] : memref<2x512xf32, #tpu.memory_space<vmem>>, vector<2x20xf32>
    tpu.vector_store %arg8[%c0_30, %c400], %57 {strides = array<i32>} : memref<2x512xf32, #tpu.memory_space<vmem>>, vector<2x20xf32>,
    %59 = vector.extract_strided_slice %14 {offsets = [42, 0], sizes = [2, 20], strides = [1, 1]} : vector<56x20xf32> to vector<2x20xf32>
    %c0_31 = arith.constant 0 : index
    %c420 = arith.constant 420 : index
    %60 = vector.load %arg8[%c0_31, %c420] : memref<2x512xf32, #tpu.memory_space<vmem>>, vector<2x20xf32>
    tpu.vector_store %arg8[%c0_31, %c420], %59 {strides = array<i32>} : memref<2x512xf32, #tpu.memory_space<vmem>>, vector<2x20xf32>,
    %61 = vector.extract_strided_slice %14 {offsets = [44, 0], sizes = [2, 20], strides = [1, 1]} : vector<56x20xf32> to vector<2x20xf32>
    %c0_32 = arith.constant 0 : index
    %c440 = arith.constant 440 : index
    %62 = vector.load %arg8[%c0_32, %c440] : memref<2x512xf32, #tpu.memory_space<vmem>>, vector<2x20xf32>
    tpu.vector_store %arg8[%c0_32, %c440], %61 {strides = array<i32>} : memref<2x512xf32, #tpu.memory_space<vmem>>, vector<2x20xf32>,
    %63 = vector.extract_strided_slice %14 {offsets = [46, 0], sizes = [2, 20], strides = [1, 1]} : vector<56x20xf32> to vector<2x20xf32>
    %c0_33 = arith.constant 0 : index
    %c460 = arith.constant 460 : index
    %64 = vector.load %arg8[%c0_33, %c460] : memref<2x512xf32, #tpu.memory_space<vmem>>, vector<2x20xf32>
    tpu.vector_store %arg8[%c0_33, %c460], %63 {strides = array<i32>} : memref<2x512xf32, #tpu.memory_space<vmem>>, vector<2x20xf32>,
    %65 = vector.extract_strided_slice %14 {offsets = [48, 0], sizes = [2, 20], strides = [1, 1]} : vector<56x20xf32> to vector<2x20xf32>
    %c0_34 = arith.constant 0 : index
    %c480 = arith.constant 480 : index
    %66 = vector.load %arg8[%c0_34, %c480] : memref<2x512xf32, #tpu.memory_space<vmem>>, vector<2x20xf32>
    tpu.vector_store %arg8[%c0_34, %c480], %65 {strides = array<i32>} : memref<2x512xf32, #tpu.memory_space<vmem>>, vector<2x20xf32>,
    %c0_35 = arith.constant 0 : index
    %c0_36 = arith.constant 0 : index
    %67 = vector.load %arg8[%c0_35, %c0_36] : memref<2x512xf32, #tpu.memory_space<vmem>>, vector<2x512xf32>
    %68 = arith.truncf %67 : vector<2x512xf32> to vector<2x512xbf16>
    %c0_37 = arith.constant 0 : index
    %c0_38 = arith.constant 0 : index
    %69 = vector.load %arg3[%c0_37, %c0_38] : memref<512x128xbf16, #tpu.memory_space<vmem>>, vector<512x128xbf16>
    %cst_39 = arith.constant dense<0.000000e+00> : vector<2x128xf32>
    %70 = tpu.matmul %68, %69, %cst_39 {dimension_numbers = #tpu.dot_dimension_numbers<[1], [0], [0], [1], [0, 0, 1, 1], [], []>} : vector<2x512xbf16>, vector<512x128xbf16>, vector<2x128xf32> -> vector<2x128xf32>
    %c0_40 = arith.constant 0 : index
    %c0_41 = arith.constant 0 : index
    %71 = vector.load %arg4[%c0_40, %c0_41] : memref<1x128xf32, #tpu.memory_space<vmem>>, vector<1x128xf32>
    %72 = vector.broadcast %71 : vector<1x128xf32> to vector<2x128xf32>
    %73 = arith.addf %70, %72 : vector<2x128xf32>
    %cst_42 = arith.constant 0.000000e+00 : f32
    %74 = vector.broadcast %cst_42 : f32 to vector<2x128xf32>
    %75 = arith.maximumf %73, %74 : vector<2x128xf32>
    %76 = arith.truncf %75 : vector<2x128xf32> to vector<2x128xbf16>
    %c0_43 = arith.constant 0 : index
    %c0_44 = arith.constant 0 : index
    %77 = vector.load %arg5[%c0_43, %c0_44] : memref<128x128xbf16, #tpu.memory_space<vmem>>, vector<128x128xbf16>
    %cst_45 = arith.constant dense<0.000000e+00> : vector<2x128xf32>
    %78 = tpu.matmul %76, %77, %cst_45 {dimension_numbers = #tpu.dot_dimension_numbers<[1], [0], [0], [1], [0, 0, 1, 1], [], []>} : vector<2x128xbf16>, vector<128x128xbf16>, vector<2x128xf32> -> vector<2x128xf32>
    %c0_46 = arith.constant 0 : index
    %c0_47 = arith.constant 0 : index
    %79 = vector.load %arg6[%c0_46, %c0_47] : memref<1x128xf32, #tpu.memory_space<vmem>>, vector<1x128xf32>
    %80 = vector.broadcast %79 : vector<1x128xf32> to vector<2x128xf32>
    %81 = arith.addf %78, %80 : vector<2x128xf32>
    %cst_48 = arith.constant dense<0xFF800000> : vector<2xf32>
    %82 = vector.multi_reduction <maximumf>, %81, %cst_48 [1] : vector<2x128xf32> to vector<2xf32>
    %83 = vector.shape_cast %82 : vector<2xf32> to vector<2x1xf32>
    %84 = vector.broadcast %83 : vector<2x1xf32> to vector<2x128xf32>
    %85 = arith.subf %81, %84 : vector<2x128xf32>
    %86 = math.exp %85 : vector<2x128xf32>
    %cst_49 = arith.constant dense<0.000000e+00> : vector<2xf32>
    %87 = vector.multi_reduction <add>, %86, %cst_49 [1] : vector<2x128xf32> to vector<2xf32>
    %88 = vector.shape_cast %87 : vector<2xf32> to vector<2x1xf32>
    %89 = math.log %88 : vector<2x1xf32>
    %90 = arith.addf %89, %83 : vector<2x1xf32>
    %91 = vector.broadcast %90 : vector<2x1xf32> to vector<2x128xf32>
    %92 = arith.subf %81, %91 : vector<2x128xf32>
    %c0_50 = arith.constant 0 : index
    %c0_51 = arith.constant 0 : index
    %93 = vector.load %arg7[%c0_50, %c0_51] : memref<2x128xf32, #tpu.memory_space<vmem>>, vector<2x128xf32>
    tpu.vector_store %arg7[%c0_50, %c0_51], %92 {strides = array<i32>} : memref<2x128xf32, #tpu.memory_space<vmem>>, vector<2x128xf32>,
    return
  }
}

</mosaic_0001>

<bundles_post_ra>
// kernel: svhn_classifier_forward.2
= control target key start
LH: loop header
LB: loop body
LE: loop exit
PB: predicated region body
PF: predicated region fallthrough
CT: control target
= control target key end

     0   :  { %s3743_s1 = inlined_call_operand.vmem [shape: bf16[128,128], index: 1, kind: input, shape index: {}]   ;;  %s3744_s0 = inlined_call_operand.vmem [shape: bf16[1568,128], index: 0, kind: input, shape index: {}]   ;;  %s3745_s2 = inlined_call_operand.vmem [shape: f32[1,128], index: 2, kind: input, shape index: {}]   ;;  %s3746_s3 = inlined_call_operand.vmem [shape: bf16[392,128], index: 3, kind: output, shape index: {}]  }
   0x1   :  { %v2864_v0 = vld [vmem:[%s3743_s1] sm:$0xff]   ;;  %v2865_v1 = vld [vmem:[%s3743_s1 + $0x8] sm:$0xff]   ;;  %v2866_v2 = vld [vmem:[%s3743_s1 + $0x10] sm:$0xff]  }
   0x2   :  { %2636 = vmatprep.subr.bf16.mxu0 %v2864_v0  ;;  %2848 = vmatprep.subr.bf16.mxu1 %v2864_v0  ;;  %v2867_v3 = vld [vmem:[%s3743_s1 + $0x18] sm:$0xff]   ;;  %v2872_v4 = vld [vmem:[%s3744_s0] sm:$0xff]   ;;  %v2873_v5 = vld [vmem:[%s3744_s0 + $0x190] sm:$0xff]  }
   0x3   :  { %2637 = vmatpush3.bf16.msra.mxu0 %v2864_v0  ;;  %2856 = vmatpush3.bf16.msra.mxu1 %v2864_v0  ;;  %v2868_v6 = vld [vmem:[%s3743_s1 + $0x20] sm:$0xff]   ;;  %v2869_v7 = vld [vmem:[%s3743_s1 + $0x28] sm:$0xff]   ;;  %v2870_v8 = vld [vmem:[%s3743_s1 + $0x30] sm:$0xff]  }
   0x4   :  { %2638 = vmatprep.subr.bf16.mxu0 %v2865_v1  ;;  %2849 = vmatprep.subr.bf16.mxu1 %v2865_v1  ;;  %v2871_v9 = vld [vmem:[%s3743_s1 + $0x38] sm:$0xff]   ;;  %v2874_v10 = vld [vmem:[%s3744_s0 + $0x8] sm:$0xff]   ;;  %v2876_v12 = vld [vmem:[%s3744_s0 + $0x10] sm:$0xff]  }
   0x5   :  { %2652 = vmatprep.mubr.bf16.mxu0 %v2872_v4  ;;  %2752 = vmatprep.mubr.bf16.mxu1 %v2873_v5  ;;  %v2875_v11 = vld [vmem:[%s3744_s0 + $0x198] sm:$0xff]   ;;  %v2877_v13 = vld [vmem:[%s3744_s0 + $0x1a0] sm:$0xff]   ;;  %v2879_v15 = vld [vmem:[%s3744_s0 + $0x1a8] sm:$0xff]  }
   0x6   :  { %v2878_v14 = vld [vmem:[%s3744_s0 + $0x18] sm:$0xff]   ;;  %v2880_v16 = vld [vmem:[%s3744_s0 + $0x20] sm:$0xff]   ;;  %v2881_v17 = vld [vmem:[%s3744_s0 + $0x1b0] sm:$0xff]  }
   0x7   :  { %2639 = vmatpush3.bf16.msra.mxu0 %v2865_v1  ;;  %2857 = vmatpush3.bf16.msra.mxu1 %v2865_v1  ;;  %v2882_v18 = vld [vmem:[%s3744_s0 + $0x28] sm:$0xff]   ;;  %v2883_v19 = vld [vmem:[%s3744_s0 + $0x1b8] sm:$0xff]   ;;  %v2884_v20 = vld [vmem:[%s3744_s0 + $0x30] sm:$0xff]  }
   0x8   :  { %2640 = vmatprep.subr.bf16.mxu0 %v2866_v2  ;;  %2850 = vmatprep.subr.bf16.mxu1 %v2866_v2  ;;  %v2885_v21 = vld [vmem:[%s3744_s0 + $0x1c0] sm:$0xff]   ;;  %v2886_v22 = vld [vmem:[%s3744_s0 + $0x38] sm:$0xff]   ;;  %v2887_v23 = vld [vmem:[%s3744_s0 + $0x1c8] sm:$0xff]  }
   0x9   :  { %v2888_v24 = vld [vmem:[%s3744_s0 + $0x40] sm:$0xff]   ;;  %v2889_v25 = vld [vmem:[%s3744_s0 + $0x1d0] sm:$0xff]   ;;  %v2890_v26 = vld [vmem:[%s3744_s0 + $0x48] sm:$0xff]  }
   0xa   :  { %v2891_v27 = vld [vmem:[%s3744_s0 + $0x1d8] sm:$0xff]   ;;  %v2892_v28 = vld [vmem:[%s3744_s0 + $0x50] sm:$0xff]   ;;  %v2893_v29 = vld [vmem:[%s3744_s0 + $0x1e0] sm:$0xff]  }
   0xb   :  { %2641 = vmatpush3.bf16.msra.mxu0 %v2866_v2  ;;  %2858 = vmatpush3.bf16.msra.mxu1 %v2866_v2  ;;  %v2894_v30 = vld [vmem:[%s3744_s0 + $0x58] sm:$0xff]   ;;  %v2895_v31 = vld [vmem:[%s3744_s0 + $0x1e8] sm:$0xff]   ;;  %v2896_v32 = vld [vmem:[%s3744_s0 + $0x60] sm:$0xff]  }
   0xc   :  { %2642 = vmatprep.subr.bf16.mxu0 %v2867_v3  ;;  %2851 = vmatprep.subr.bf16.mxu1 %v2867_v3  ;;  %v2897_v33 = vld [vmem:[%s3744_s0 + $0x1f0] sm:$0xff]   ;;  %v2898_v34 = vld [vmem:[%s3744_s0 + $0x68] sm:$0xff]   ;;  %v2899_v35 = vld [vmem:[%s3744_s0 + $0x1f8] sm:$0xff]  }
   0xd   :  { %v2900_v36 = vld [vmem:[%s3744_s0 + $0x70] sm:$0xff]   ;;  %v2901_v37 = vld [vmem:[%s3744_s0 + $0x200] sm:$0xff]   ;;  %v2902_v38 = vld [vmem:[%s3744_s0 + $0x78] sm:$0xff]  }
   0xe   :  { %v2903_v39 = vld [vmem:[%s3744_s0 + $0x208] sm:$0xff]   ;;  %v2904_v40 = vld [vmem:[%s3744_s0 + $0x80] sm:$0xff]   ;;  %v2905_v41 = vld [vmem:[%s3744_s0 + $0x210] sm:$0xff]  }
   0xf   :  { %2643 = vmatpush3.bf16.msra.mxu0 %v2867_v3  ;;  %2859 = vmatpush3.bf16.msra.mxu1 %v2867_v3  ;;  %v2906_v42 = vld [vmem:[%s3744_s0 + $0x88] sm:$0xff]   ;;  %v2907_v43 = vld [vmem:[%s3744_s0 + $0x218] sm:$0xff]   ;;  %v2908_v44 = vld [vmem:[%s3744_s0 + $0x90] sm:$0xff]  }
  0x10   :  { %2644 = vmatprep.subr.bf16.mxu0 %v2868_v6  ;;  %2852 = vmatprep.subr.bf16.mxu1 %v2868_v6  ;;  %v2909_v45 = vld [vmem:[%s3744_s0 + $0x220] sm:$0xff]   ;;  %v2910_v46 = vld [vmem:[%s3744_s0 + $0x98] sm:$0xff]   ;;  %v2911_v47 = vld [vmem:[%s3744_s0 + $0x228] sm:$0xff]  }
  0x11   :  { %v2912_v48 = vld [vmem:[%s3744_s0 + $0xa0] sm:$0xff]   ;;  %v2913_v49 = vld [vmem:[%s3744_s0 + $0x230] sm:$0xff]   ;;  %v2914_v50 = vld [vmem:[%s3744_s0 + $0xa8] sm:$0xff]  }
  0x12   :  { %v2915_v51 = vld [vmem:[%s3744_s0 + $0x238] sm:$0xff]   ;;  %v2916_v52 = vld [vmem:[%s3744_s0 + $0xb0] sm:$0xff]   ;;  %v2917_v53 = vld [vmem:[%s3744_s0 + $0x240] sm:$0xff]  }
  0x13   :  { %2645 = vmatpush3.bf16.msra.mxu0 %v2868_v6  ;;  %2860 = vmatpush3.bf16.msra.mxu1 %v2868_v6  ;;  %v2918_v54 = vld [vmem:[%s3744_s0 + $0xb8] sm:$0xff]   ;;  %v2919_v55 = vld [vmem:[%s3744_s0 + $0x248] sm:$0xff]   ;;  %v2920_v56 = vld [vmem:[%s3744_s0 + $0xc0] sm:$0xff]  }
  0x14   :  { %2646 = vmatprep.subr.bf16.mxu0 %v2869_v7  ;;  %2853 = vmatprep.subr.bf16.mxu1 %v2869_v7  ;;  %v2921_v57 = vld [vmem:[%s3744_s0 + $0x250] sm:$0xff]   ;;  %v2922_v58 = vld [vmem:[%s3744_s0 + $0xc8] sm:$0xff]   ;;  %v2923_v59 = vld [vmem:[%s3744_s0 + $0x258] sm:$0xff]  }
  0x15   :  { %v2924_v60 = vld [vmem:[%s3744_s0 + $0xd0] sm:$0xff]   ;;  %v2925_v61 = vld [vmem:[%s3744_s0 + $0x260] sm:$0xff]   ;;  %v2926_v62 = vld [vmem:[%s3744_s0 + $0xd8] sm:$0xff]  }
  0x16   :  { %v2927_v63 = vld [vmem:[%s3744_s0 + $0x268] sm:$0xff]   ;;  %v2928_v0 = vld [vmem:[%s3744_s0 + $0xe0] sm:$0xff]   ;;  %v2929_v1 = vld [vmem:[%s3744_s0 + $0x270] sm:$0xff]  }
  0x17   :  { %2647 = vmatpush3.bf16.msra.mxu0 %v2869_v7  ;;  %2861 = vmatpush3.bf16.msra.mxu1 %v2869_v7  ;;  %v2930_v2 = vld [vmem:[%s3744_s0 + $0xe8] sm:$0xff]   ;;  %v2931_v3 = vld [vmem:[%s3744_s0 + $0x278] sm:$0xff]   ;;  %v2932_v4 = vld [vmem:[%s3744_s0 + $0xf0] sm:$0xff]  }
  0x18   :  { %2648 = vmatprep.subr.bf16.mxu0 %v2870_v8  ;;  %2854 = vmatprep.subr.bf16.mxu1 %v2870_v8  ;;  %v2933_v5 = vld [vmem:[%s3744_s0 + $0x280] sm:$0xff]   ;;  %v2934_v6 = vld [vmem:[%s3744_s0 + $0xf8] sm:$0xff]   ;;  %v2935_v7 = vld [vmem:[%s3744_s0 + $0x288] sm:$0xff]  }
  0x1b   :  { %2649 = vmatpush3.bf16.msra.mxu0 %v2870_v8  ;;  %2862 = vmatpush3.bf16.msra.mxu1 %v2870_v8  ;;  %v2936_v8 = vld [vmem:[%s3744_s0 + $0x100] sm:$0xff]  }
  0x1c   :  { %2650 = vmatprep.subr.bf16.mxu0 %v2871_v9  ;;  %2855 = vmatprep.subr.bf16.mxu1 %v2871_v9 }
  0x1f   :  { %2651 = vmatpush3.bf16.msra.mxu0 %v2871_v9  ;;  %2863 = vmatpush3.bf16.msra.mxu1 %v2871_v9  ;;  %v2937_v9 = vld [vmem:[%s3744_s0 + $0x290] sm:$0xff]  }
  0x22   :  { %2653 = vmatmul.mubr.bf16.vlgmr.msra.gmra.mrb[0].mxu0 %v2874_v10  ;;  %2753 = vmatmul.mubr.bf16.vlgmr.msra.gmra.mrb[0].mxu1 %v2875_v11  ;;  %v2938_v10 = vld [vmem:[%s3744_s0 + $0x108] sm:$0xff]   ;;  %v2939_v11 = vld [vmem:[%s3744_s0 + $0x298] sm:$0xff]  }
  0x23   :  { %2656 = vmatprep.mubr.bf16.mxu0 %v2876_v12  ;;  %2756 = vmatprep.mubr.bf16.mxu1 %v2877_v13  ;;  %v2940_v12 = vld [vmem:[%s3744_s0 + $0x110] sm:$0xff]   ;;  %v2941_v13 = vld [vmem:[%s3744_s0 + $0x2a0] sm:$0xff]  }
  0x2a   :  { %2657 = vmatmul.mubr.bf16.gmra.mrb[4].mxu0 %v2878_v14  ;;  %2757 = vmatmul.mubr.bf16.gmra.mrb[4].mxu1 %v2879_v15  ;;  %v2942_v14 = vld [vmem:[%s3744_s0 + $0x118] sm:$0xff]   ;;  %v2943_v15 = vld [vmem:[%s3744_s0 + $0x2a8] sm:$0xff]  }
  0x2b   :  { %2660 = vmatprep.mubr.bf16.mxu0 %v2880_v16  ;;  %2760 = vmatprep.mubr.bf16.mxu1 %v2881_v17  ;;  %v2944_v16 = vld [vmem:[%s3744_s0 + $0x120] sm:$0xff]   ;;  %v2945_v17 = vld [vmem:[%s3744_s0 + $0x2b0] sm:$0xff]  }
  0x32   :  { %2661 = vmatmul.mubr.bf16.gmra.mrb[8].mxu0 %v2882_v18  ;;  %2761 = vmatmul.mubr.bf16.gmra.mrb[8].mxu1 %v2883_v19  ;;  %v2946_v18 = vld [vmem:[%s3744_s0 + $0x128] sm:$0xff]   ;;  %v2947_v19 = vld [vmem:[%s3744_s0 + $0x2b8] sm:$0xff]  }
  0x33   :  { %2664 = vmatprep.mubr.bf16.mxu0 %v2884_v20  ;;  %2764 = vmatprep.mubr.bf16.mxu1 %v2885_v21  ;;  %v2948_v20 = vld [vmem:[%s3744_s0 + $0x130] sm:$0xff]   ;;  %v2949_v21 = vld [vmem:[%s3744_s0 + $0x2c0] sm:$0xff]  }
  0x3a   :  { %2665 = vmatmul.mubr.bf16.gmra.mrb[12].mxu0 %v2886_v22  ;;  %2765 = vmatmul.mubr.bf16.gmra.mrb[12].mxu1 %v2887_v23  ;;  %v2950_v22 = vld [vmem:[%s3744_s0 + $0x138] sm:$0xff]   ;;  %v2951_v23 = vld [vmem:[%s3744_s0 + $0x2c8] sm:$0xff]  }
  0x3b   :  { %2668 = vmatprep.mubr.bf16.mxu0 %v2888_v24  ;;  %2768 = vmatprep.mubr.bf16.mxu1 %v2889_v25  ;;  %v2952_v24 = vld [vmem:[%s3744_s0 + $0x140] sm:$0xff]   ;;  %v2953_v25 = vld [vmem:[%s3744_s0 + $0x2d0] sm:$0xff]  }
  0x42   :  { %2669 = vmatmul.mubr.bf16.gmra.mrb[16].mxu0 %v2890_v26  ;;  %2769 = vmatmul.mubr.bf16.gmra.mrb[16].mxu1 %v2891_v27  ;;  %v2954_v26 = vld [vmem:[%s3744_s0 + $0x148] sm:$0xff]   ;;  %v2955_v27 = vld [vmem:[%s3744_s0 + $0x2d8] sm:$0xff]  }
  0x43   :  { %2672 = vmatprep.mubr.bf16.mxu0 %v2892_v28  ;;  %2772 = vmatprep.mubr.bf16.mxu1 %v2893_v29  ;;  %v2956_v28 = vld [vmem:[%s3744_s0 + $0x150] sm:$0xff]   ;;  %v2957_v29 = vld [vmem:[%s3744_s0 + $0x2e0] sm:$0xff]  }
  0x4a   :  { %2673 = vmatmul.mubr.bf16.gmra.mrb[20].mxu0 %v2894_v30  ;;  %2773 = vmatmul.mubr.bf16.gmra.mrb[20].mxu1 %v2895_v31  ;;  %v2958_v30 = vld [vmem:[%s3744_s0 + $0x158] sm:$0xff]   ;;  %v2959_v31 = vld [vmem:[%s3744_s0 + $0x2e8] sm:$0xff]  }
  0x4b   :  { %2676 = vmatprep.mubr.bf16.mxu0 %v2896_v32  ;;  %2776 = vmatprep.mubr.bf16.mxu1 %v2897_v33  ;;  %v2960_v32 = vld [vmem:[%s3744_s0 + $0x160] sm:$0xff]   ;;  %v2961_v33 = vld [vmem:[%s3744_s0 + $0x2f0] sm:$0xff]  }
  0x52   :  { %2677 = vmatmul.mubr.bf16.gmra.mrb[24].mxu0 %v2898_v34  ;;  %2777 = vmatmul.mubr.bf16.gmra.mrb[24].mxu1 %v2899_v35  ;;  %v2962_v34 = vld [vmem:[%s3744_s0 + $0x168] sm:$0xff]   ;;  %v2963_v35 = vld [vmem:[%s3744_s0 + $0x2f8] sm:$0xff]  }
  0x53   :  { %2680 = vmatprep.mubr.bf16.mxu0 %v2900_v36  ;;  %2780 = vmatprep.mubr.bf16.mxu1 %v2901_v37  ;;  %v2964_v36 = vld [vmem:[%s3744_s0 + $0x170] sm:$0xff]   ;;  %v2965_v37 = vld [vmem:[%s3744_s0 + $0x300] sm:$0xff]  }
  0x5a   :  { %2681 = vmatmul.mubr.bf16.gmra.mrb[28].mxu0 %v2902_v38  ;;  %2781 = vmatmul.mubr.bf16.gmra.mrb[28].mxu1 %v2903_v39  ;;  %v2966_v38 = vld [vmem:[%s3744_s0 + $0x178] sm:$0xff]   ;;  %v2967_v39 = vld [vmem:[%s3744_s0 + $0x308] sm:$0xff]  }
  0x5b   :  { %2684 = vmatprep.mubr.bf16.mxu0 %v2904_v40  ;;  %2784 = vmatprep.mubr.bf16.mxu1 %v2905_v41  ;;  %v2968_v40 = vld [vmem:[%s3744_s0 + $0x180] sm:$0xff]   ;;  %v2969_v41 = vld [vmem:[%s3744_s0 + $0x188] sm:$0xff]  }
  0x62   :  { %2685 = vmatmul.mubr.bf16.gmra.mrb[32].mxu0 %v2906_v42  ;;  %2785 = vmatmul.mubr.bf16.gmra.mrb[32].mxu1 %v2907_v43 }
  0x63   :  { %2688 = vmatprep.mubr.bf16.mxu0 %v2908_v44  ;;  %2788 = vmatprep.mubr.bf16.mxu1 %v2909_v45 }
  0x6a   :  { %2689 = vmatmul.mubr.bf16.gmra.mrb[36].mxu0 %v2910_v46  ;;  %2789 = vmatmul.mubr.bf16.gmra.mrb[36].mxu1 %v2911_v47 }
  0x6b   :  { %2692 = vmatprep.mubr.bf16.mxu0 %v2912_v48  ;;  %2792 = vmatprep.mubr.bf16.mxu1 %v2913_v49 }
  0x72   :  { %2693 = vmatmul.mubr.bf16.gmra.mrb[40].mxu0 %v2914_v50  ;;  %2793 = vmatmul.mubr.bf16.gmra.mrb[40].mxu1 %v2915_v51 }
  0x73   :  { %2696 = vmatprep.mubr.bf16.mxu0 %v2916_v52  ;;  %2796 = vmatprep.mubr.bf16.mxu1 %v2917_v53 }
  0x7a   :  { %2697 = vmatmul.mubr.bf16.gmra.mrb[44].mxu0 %v2918_v54  ;;  %2797 = vmatmul.mubr.bf16.gmra.mrb[44].mxu1 %v2919_v55 }
  0x7b   :  { %2700 = vmatprep.mubr.bf16.mxu0 %v2920_v56  ;;  %2800 = vmatprep.mubr.bf16.mxu1 %v2921_v57 }
  0x82   :  { %2701 = vmatmul.mubr.bf16.gmra.mrb[48].mxu0 %v2922_v58  ;;  %2801 = vmatmul.mubr.bf16.gmra.mrb[48].mxu1 %v2923_v59 }
  0x83   :  { %2704 = vmatprep.mubr.bf16.mxu0 %v2924_v60  ;;  %2804 = vmatprep.mubr.bf16.mxu1 %v2925_v61 }
  0x8a   :  { %2705 = vmatmul.mubr.bf16.gmra.mrb[52].mxu0 %v2926_v62  ;;  %2805 = vmatmul.mubr.bf16.gmra.mrb[52].mxu1 %v2927_v63 }
  0x8b   :  { %2708 = vmatprep.mubr.bf16.mxu0 %v2928_v0  ;;  %2808 = vmatprep.mubr.bf16.mxu1 %v2929_v1 }
  0x92   :  { %2709 = vmatmul.mubr.bf16.gmra.mrb[56].mxu0 %v2930_v2  ;;  %2809 = vmatmul.mubr.bf16.gmra.mrb[56].mxu1 %v2931_v3 }
  0x93   :  { %2712 = vmatprep.mubr.bf16.mxu0 %v2932_v4  ;;  %2812 = vmatprep.mubr.bf16.mxu1 %v2933_v5 }
  0x9a   :  { %2713 = vmatmul.mubr.bf16.gmra.mrb[60].mxu0 %v2934_v6  ;;  %2813 = vmatmul.mubr.bf16.gmra.mrb[60].mxu1 %v2935_v7 }
  0x9b   :  { %2716 = vmatprep.mubr.bf16.mxu0 %v2936_v8  ;;  %2816 = vmatprep.mubr.bf16.mxu1 %v2937_v9 }
  0xa2   :  { %2717 = vmatmul.mubr.bf16.gmra.mrb[64].mxu0 %v2938_v10  ;;  %2817 = vmatmul.mubr.bf16.gmra.mrb[64].mxu1 %v2939_v11 }
  0xa3   :  { %2720 = vmatprep.mubr.bf16.mxu0 %v2940_v12  ;;  %2820 = vmatprep.mubr.bf16.mxu1 %v2941_v13 }
  0xaa   :  { %2721 = vmatmul.mubr.bf16.gmra.mrb[68].mxu0 %v2942_v14  ;;  %2821 = vmatmul.mubr.bf16.gmra.mrb[68].mxu1 %v2943_v15 }
  0xab   :  { %2724 = vmatprep.mubr.bf16.mxu0 %v2944_v16  ;;  %2824 = vmatprep.mubr.bf16.mxu1 %v2945_v17 }
  0xb2   :  { %2725 = vmatmul.mubr.bf16.gmra.mrb[72].mxu0 %v2946_v18  ;;  %2825 = vmatmul.mubr.bf16.gmra.mrb[72].mxu1 %v2947_v19 }
  0xb3   :  { %2728 = vmatprep.mubr.bf16.mxu0 %v2948_v20  ;;  %2828 = vmatprep.mubr.bf16.mxu1 %v2949_v21 }
  0xba   :  { %2729 = vmatmul.mubr.bf16.gmra.mrb[76].mxu0 %v2950_v22  ;;  %2829 = vmatmul.mubr.bf16.gmra.mrb[76].mxu1 %v2951_v23 }
  0xbb   :  { %2732 = vmatprep.mubr.bf16.mxu0 %v2952_v24  ;;  %2832 = vmatprep.mubr.bf16.mxu1 %v2953_v25 }
  0xc2   :  { %2733 = vmatmul.mubr.bf16.gmra.mrb[80].mxu0 %v2954_v26  ;;  %2833 = vmatmul.mubr.bf16.gmra.mrb[80].mxu1 %v2955_v27 }
  0xc3   :  { %2736 = vmatprep.mubr.bf16.mxu0 %v2956_v28  ;;  %2836 = vmatprep.mubr.bf16.mxu1 %v2957_v29 }
  0xca   :  { %2737 = vmatmul.mubr.bf16.gmra.mrb[84].mxu0 %v2958_v30  ;;  %2837 = vmatmul.mubr.bf16.gmra.mrb[84].mxu1 %v2959_v31 }
  0xcb   :  { %2740 = vmatprep.mubr.bf16.mxu0 %v2960_v32  ;;  %2840 = vmatprep.mubr.bf16.mxu1 %v2961_v33 }
  0xd2   :  { %2741 = vmatmul.mubr.bf16.gmra.mrb[88].mxu0 %v2962_v34  ;;  %2841 = vmatmul.mubr.bf16.gmra.mrb[88].mxu1 %v2963_v35 }
  0xd3   :  { %2744 = vmatprep.mubr.bf16.mxu0 %v2964_v36  ;;  %2844 = vmatprep.mubr.bf16.mxu1 %v2965_v37 }
  0xda   :  { %2745 = vmatmul.mubr.bf16.gmra.mrb[92].mxu0 %v2966_v38  ;;  %2845 = vmatmul.mubr.bf16.gmra.mrb[92].mxu1 %v2967_v39 }
  0xdb   :  { %2748 = vmatprep.mubr.bf16.mxu0 %v2968_v40 }
  0xe2   :  { %2749 = vmatmul.mubr.bf16.gmra.mrb[96].mxu0 %v2969_v41 }
  0xf5   :  { %v3308_v42 = vpop.f32.mrb[0].mxu0  ;;  %v3310_v43 = vpop.f32.mrb[0].mxu1 }
  0xf6   :  { %v3312_v44 = vpop.f32.mrb[1].mxu0  ;;  %v3314_v45 = vpop.f32.mrb[1].mxu1 }
  0xf7   :  { %3751 = vst [vmem:[#allocation2_spill] sm:$0xff] %v3312_v44  ;;  %v3316_v46 = vpop.f32.mrb[2].mxu0  ;;  %v3318_v47 = vpop.f32.mrb[2].mxu1 }
  0xf8   :  { %v3320_v48 = vpop.f32.mrb[3].mxu0  ;;  %v3322_v49 = vpop.f32.mrb[3].mxu1 }
  0xf9   :  { %3752 = vst [vmem:[#allocation3_spill] sm:$0xff] %v3320_v48 }
  0xfd   :  { %v3324_v50 = vpop.f32.mrb[4].mxu0  ;;  %v3326_v51 = vpop.f32.mrb[4].mxu1 }
  0xfe   :  { %v3328_v52 = vpop.f32.mrb[5].mxu0  ;;  %v3330_v53 = vpop.f32.mrb[5].mxu1 }
  0xff   :  { %v3332_v54 = vpop.f32.mrb[6].mxu0  ;;  %v3334_v55 = vpop.f32.mrb[6].mxu1 }
 0x100   :  { %v3336_v56 = vpop.f32.mrb[7].mxu0  ;;  %v3338_v57 = vpop.f32.mrb[7].mxu1 }
 0x105   :  { %v3340_v58 = vpop.f32.mrb[8].mxu0  ;;  %v3342_v59 = vpop.f32.mrb[8].mxu1 }
 0x106   :  { %v3344_v60 = vpop.f32.mrb[9].mxu0  ;;  %v3346_v61 = vpop.f32.mrb[9].mxu1 }
 0x107   :  { %v3348_v62 = vpop.f32.mrb[10].mxu0  ;;  %v3350_v63 = vpop.f32.mrb[10].mxu1 }
 0x108   :  { %v3352_v0 = vpop.f32.mrb[11].mxu0  ;;  %v3354_v1 = vpop.f32.mrb[11].mxu1 }
 0x10d   :  { %v3356_v2 = vpop.f32.mrb[12].mxu0  ;;  %v3358_v3 = vpop.f32.mrb[12].mxu1 }
 0x10e   :  { %v3360_v4 = vpop.f32.mrb[13].mxu0  ;;  %v3362_v5 = vpop.f32.mrb[13].mxu1 }
 0x10f   :  { %v3364_v6 = vpop.f32.mrb[14].mxu0  ;;  %v3366_v7 = vpop.f32.mrb[14].mxu1 }
 0x110   :  { %v3368_v8 = vpop.f32.mrb[15].mxu0  ;;  %v3370_v9 = vpop.f32.mrb[15].mxu1 }
 0x115   :  { %v3372_v10 = vpop.f32.mrb[16].mxu0  ;;  %v3374_v11 = vpop.f32.mrb[16].mxu1 }
 0x116   :  { %v3376_v12 = vpop.f32.mrb[17].mxu0  ;;  %v3378_v13 = vpop.f32.mrb[17].mxu1 }
 0x117   :  { %v3380_v14 = vpop.f32.mrb[18].mxu0  ;;  %v3382_v15 = vpop.f32.mrb[18].mxu1 }
 0x118   :  { %v3384_v16 = vpop.f32.mrb[19].mxu0  ;;  %v3386_v17 = vpop.f32.mrb[19].mxu1 }
 0x11d   :  { %v3388_v18 = vpop.f32.mrb[20].mxu0  ;;  %v3390_v19 = vpop.f32.mrb[20].mxu1 }
 0x11e   :  { %v3392_v20 = vpop.f32.mrb[21].mxu0  ;;  %v3394_v21 = vpop.f32.mrb[21].mxu1 }
 0x11f   :  { %v3396_v22 = vpop.f32.mrb[22].mxu0  ;;  %v3398_v23 = vpop.f32.mrb[22].mxu1 }
 0x120   :  { %v3400_v24 = vpop.f32.mrb[23].mxu0  ;;  %v3402_v25 = vpop.f32.mrb[23].mxu1 }
 0x125   :  { %v3404_v26 = vpop.f32.mrb[24].mxu0  ;;  %v3406_v27 = vpop.f32.mrb[24].mxu1 }
 0x126   :  { %3753 = vst [vmem:[#allocation4_spill] sm:$0xff] %v3404_v26  ;;  %3754 = vst [vmem:[#allocation5_spill] sm:$0xff] %v3406_v27  ;;  %v3408_v28 = vpop.f32.mrb[25].mxu0  ;;  %v3410_v29 = vpop.f32.mrb[25].mxu1 }
 0x127   :  { %3755 = vst [vmem:[#allocation6_spill] sm:$0xff] %v3408_v28  ;;  %3756 = vst [vmem:[#allocation7_spill] sm:$0xff] %v3410_v29  ;;  %v3412_v30 = vpop.f32.mrb[26].mxu0  ;;  %v3414_v31 = vpop.f32.mrb[26].mxu1 }
 0x128   :  { %3757 = vst [vmem:[#allocation8_spill] sm:$0xff] %v3412_v30  ;;  %3758 = vst [vmem:[#allocation9_spill] sm:$0xff] %v3414_v31  ;;  %v3416_v32 = vpop.f32.mrb[27].mxu0  ;;  %v3418_v33 = vpop.f32.mrb[27].mxu1 }
 0x12d   :  { %v3420_v34 = vpop.f32.mrb[28].mxu0  ;;  %v3422_v35 = vpop.f32.mrb[28].mxu1 }
 0x12e   :  { %3759 = vst [vmem:[#allocation10_spill] sm:$0xff] %v3420_v34  ;;  %3760 = vst [vmem:[#allocation11_spill] sm:$0xff] %v3422_v35  ;;  %v3424_v36 = vpop.f32.mrb[29].mxu0  ;;  %v3426_v37 = vpop.f32.mrb[29].mxu1 }
 0x12f   :  { %3761 = vst [vmem:[#allocation12_spill] sm:$0xff] %v3424_v36  ;;  %3762 = vst [vmem:[#allocation13_spill] sm:$0xff] %v3426_v37  ;;  %v3428_v38 = vpop.f32.mrb[30].mxu0  ;;  %v3430_v39 = vpop.f32.mrb[30].mxu1 }
 0x130   :  { %3763 = vst [vmem:[#allocation14_spill] sm:$0xff] %v3428_v38  ;;  %3764 = vst [vmem:[#allocation15_spill] sm:$0xff] %v3430_v39  ;;  %v3432_v40 = vpop.f32.mrb[31].mxu0  ;;  %v3434_v41 = vpop.f32.mrb[31].mxu1 }
 0x131   :  { %3765 = vst [vmem:[#allocation16_spill] sm:$0xff] %v3432_v40  ;;  %3766 = vst [vmem:[#allocation17_spill] sm:$0xff] %v3434_v41 }
 0x135   :  { %v3436_v31 = vpop.f32.mrb[32].mxu0  ;;  %v3438_v30 = vpop.f32.mrb[32].mxu1 }
 0x136   :  { %3767 = vst [vmem:[#allocation18_spill] sm:$0xff] %v3436_v31  ;;  %3768 = vst [vmem:[#allocation19_spill] sm:$0xff] %v3438_v30  ;;  %v3440_v29 = vpop.f32.mrb[33].mxu0  ;;  %v3442_v34 = vpop.f32.mrb[33].mxu1 }
 0x137   :  { %3769 = vst [vmem:[#allocation20_spill] sm:$0xff] %v3440_v29  ;;  %3770 = vst [vmem:[#allocation21_spill] sm:$0xff] %v3442_v34  ;;  %v3444_v35 = vpop.f32.mrb[34].mxu0  ;;  %v3446_v36 = vpop.f32.mrb[34].mxu1 }
 0x138   :  { %3771 = vst [vmem:[#allocation22_spill] sm:$0xff] %v3444_v35  ;;  %3772 = vst [vmem:[#allocation23_spill] sm:$0xff] %v3446_v36  ;;  %v3448_v37 = vpop.f32.mrb[35].mxu0  ;;  %v3450_v38 = vpop.f32.mrb[35].mxu1 }
 0x139   :  { %3773 = vst [vmem:[#allocation24_spill] sm:$0xff] %v3448_v37  ;;  %3774 = vst [vmem:[#allocation25_spill] sm:$0xff] %v3450_v38 }
 0x13d   :  { %v3452_v39 = vpop.f32.mrb[36].mxu0  ;;  %v3454_v40 = vpop.f32.mrb[36].mxu1 }
 0x13e   :  { %3775 = vst [vmem:[#allocation26_spill] sm:$0xff] %v3452_v39  ;;  %3776 = vst [vmem:[#allocation27_spill] sm:$0xff] %v3454_v40  ;;  %v3456_v41 = vpop.f32.mrb[37].mxu0  ;;  %v3458_v31 = vpop.f32.mrb[37].mxu1 }
 0x13f   :  { %3777 = vst [vmem:[#allocation28_spill] sm:$0xff] %v3456_v41  ;;  %3778 = vst [vmem:[#allocation29_spill] sm:$0xff] %v3458_v31  ;;  %v3460_v30 = vpop.f32.mrb[38].mxu0  ;;  %v3462_v29 = vpop.f32.mrb[38].mxu1 }
 0x140   :  { %3779 = vst [vmem:[#allocation30_spill] sm:$0xff] %v3460_v30  ;;  %3780 = vst [vmem:[#allocation31_spill] sm:$0xff] %v3462_v29  ;;  %v3464_v34 = vpop.f32.mrb[39].mxu0  ;;  %v3466_v35 = vpop.f32.mrb[39].mxu1 }
 0x141   :  { %3781 = vst [vmem:[#allocation32_spill] sm:$0xff] %v3464_v34  ;;  %3782 = vst [vmem:[#allocation33_spill] sm:$0xff] %v3466_v35 }
 0x145   :  { %v3468_v36 = vpop.f32.mrb[40].mxu0  ;;  %v3470_v37 = vpop.f32.mrb[40].mxu1 }
 0x146   :  { %3783 = vst [vmem:[#allocation34_spill] sm:$0xff] %v3468_v36  ;;  %3784 = vst [vmem:[#allocation35_spill] sm:$0xff] %v3470_v37  ;;  %v3472_v38 = vpop.f32.mrb[41].mxu0  ;;  %v3474_v39 = vpop.f32.mrb[41].mxu1 }
 0x147   :  { %3785 = vst [vmem:[#allocation36_spill] sm:$0xff] %v3472_v38  ;;  %3786 = vst [vmem:[#allocation37_spill] sm:$0xff] %v3474_v39  ;;  %v3476_v40 = vpop.f32.mrb[42].mxu0  ;;  %v3478_v41 = vpop.f32.mrb[42].mxu1 }
 0x148   :  { %3787 = vst [vmem:[#allocation38_spill] sm:$0xff] %v3476_v40  ;;  %3788 = vst [vmem:[#allocation39_spill] sm:$0xff] %v3478_v41  ;;  %v3480_v31 = vpop.f32.mrb[43].mxu0  ;;  %v3482_v30 = vpop.f32.mrb[43].mxu1 }
 0x149   :  { %3789 = vst [vmem:[#allocation40_spill] sm:$0xff] %v3480_v31  ;;  %3790 = vst [vmem:[#allocation41_spill] sm:$0xff] %v3482_v30 }
 0x14d   :  { %v3484_v29 = vpop.f32.mrb[44].mxu0  ;;  %v3486_v34 = vpop.f32.mrb[44].mxu1 }
 0x14e   :  { %3791 = vst [vmem:[#allocation42_spill] sm:$0xff] %v3484_v29  ;;  %3792 = vst [vmem:[#allocation43_spill] sm:$0xff] %v3486_v34  ;;  %v3488_v35 = vpop.f32.mrb[45].mxu0  ;;  %v3490_v36 = vpop.f32.mrb[45].mxu1 }
 0x14f   :  { %3793 = vst [vmem:[#allocation44_spill] sm:$0xff] %v3488_v35  ;;  %3794 = vst [vmem:[#allocation45_spill] sm:$0xff] %v3490_v36  ;;  %v3492_v37 = vpop.f32.mrb[46].mxu0  ;;  %v3494_v38 = vpop.f32.mrb[46].mxu1 }
 0x150   :  { %3795 = vst [vmem:[#allocation46_spill] sm:$0xff] %v3492_v37  ;;  %3796 = vst [vmem:[#allocation47_spill] sm:$0xff] %v3494_v38  ;;  %v3496_v39 = vpop.f32.mrb[47].mxu0  ;;  %v3498_v40 = vpop.f32.mrb[47].mxu1 }
 0x151   :  { %3797 = vst [vmem:[#allocation48_spill] sm:$0xff] %v3496_v39  ;;  %3798 = vst [vmem:[#allocation49_spill] sm:$0xff] %v3498_v40 }
 0x155   :  { %v3500_v41 = vpop.f32.mrb[48].mxu0  ;;  %v2802_v31 = vpop.f32.mrb[48].mxu1 }
 0x156   :  { %3799 = vst [vmem:[#allocation50_spill] sm:$0xff] %v3500_v41  ;;  %v1732_v34 = vmax.f32 %v3322_v49, %v2802_v31  ;;  %v3505_v30 = vpop.f32.mrb[49].mxu0  ;;  %v3507_v35 = vpop.f32.mrb[49].mxu1  ;;  %v3519_v49 = vld [vmem:[%s3745_s2] ss:$0 sm:$0xff] }
 0x157   :  { %3800 = vst [vmem:[#allocation51_spill] sm:$0xff] %v3505_v30  ;;  %3801 = vst [vmem:[#allocation52_spill] sm:$0xff] %v3507_v35  ;;  %v2703_v36 = vpop.f32.mrb[50].mxu0  ;;  %v2803_v37 = vpop.f32.mrb[50].mxu1 }
 0x158   :  { %v1682_v38 = vmax.f32 %v3308_v42, %v2703_v36  ;;  %v1733_v39 = vmax.f32 %v3310_v43, %v2803_v37  ;;  %v3511_v28 = vpop.f32.mrb[51].mxu0  ;;  %v1492_v40 = vpop.f32.mrb[51].mxu1 }
 0x159   :  { %3802 = vst [vmem:[#allocation53_spill] sm:$0xff] %v3511_v28  ;;  %v1731_v29 = vmax.f32 %v3314_v45, %v1492_v40 }
 0x15b   :  { %v1780_v41 = vmax.f32 %v1682_v38, %v1731_v29 }
 0x15d   :  { %v2706_v31 = vpop.f32.mrb[52].mxu0  ;;  %v2806_v48 = vpop.f32.mrb[52].mxu1  ;;  %v1836_v29 = vadd.f32 %v3519_v49, %v1780_v41 }
 0x15e   :  { %v1685_v42 = vmax.f32 %v3336_v56, %v2706_v31  ;;  %v1736_v43 = vmax.f32 %v3338_v57, %v2806_v48  ;;  %v1105_v36 = vpop.f32.mrb[53].mxu0  ;;  %v1505_v37 = vpop.f32.mrb[53].mxu1 }
 0x15f   :  { %v1683_v30 = vmax.f32 %v3316_v46, %v1105_v36  ;;  %v1734_v27 = vmax.f32 %v3318_v47, %v1505_v37  ;;  %v2707_v35 = vpop.f32.mrb[54].mxu0  ;;  %v2807_v45 = vpop.f32.mrb[54].mxu1  ;;  %v1885_v37 = vmax.f32 %v1836_v29, 0.0 }
 0x160   :  { %v1686_v38 = vmax.f32 %v3324_v50, %v2707_v35  ;;  %v1737_v40 = vmax.f32 %v3326_v51, %v2807_v45  ;;  %v1108_v28 = vpop.f32.mrb[55].mxu0  ;;  %v1508_v44 = vpop.f32.mrb[55].mxu1 }
 0x161   :  { %v1781_v26 = vmax.f32 %v1683_v30, %v1732_v34  ;;  %v1783_v56 = vmax.f32 %v1685_v42, %v1734_v27  ;;  %v1684_v48 = vmax.f32 %v3328_v52, %v1108_v28  ;;  %v1735_v57 = vmax.f32 %v3330_v53, %v1508_v44 }
 0x163   :  { %v1837_v46 = vadd.f32 %v3519_v49, %v1781_v26  ;;  %v1839_v47 = vadd.f32 %v3519_v49, %v1783_v56  ;;  %v1782_v31 = vmax.f32 %v1684_v48, %v1733_v39  ;;  %v1784_v36 = vmax.f32 %v1686_v38, %v1735_v57 }
 0x165   :  { %v1886_v41 = vmax.f32 %v1837_v46, 0.0  ;;  %v1838_v50 = vadd.f32 %v3519_v49, %v1782_v31  ;;  %v2710_v35 = vpop.f32.mrb[56].mxu0  ;;  %v2810_v51 = vpop.f32.mrb[56].mxu1  ;;  %v1888_v44 = vmax.f32 %v1839_v47, 0.0  ;;  %v1840_v42 = vadd.f32 %v3519_v49, %v1784_v36 }
 0x166   :  { %v1689_v45 = vmax.f32 %v3352_v0, %v2710_v35  ;;  %v1740_v27 = vmax.f32 %v3354_v1, %v2810_v51  ;;  %v1121_v30 = vpop.f32.mrb[57].mxu0  ;;  %v1521_v52 = vpop.f32.mrb[57].mxu1 }
 0x167   :  { %v2395_v28 = vpack.c.bf16 %v1886_v41, %v1885_v37  ;;  %v1887_v53 = vmax.f32 %v1838_v50, 0.0  ;;  %v1687_v26 = vmax.f32 %v3332_v54, %v1121_v30  ;;  %v2711_v34 = vpop.f32.mrb[58].mxu0  ;;  %v2811_v39 = vpop.f32.mrb[58].mxu1  ;;  %v1738_v29 = vmax.f32 %v3334_v55, %v1521_v52 }
 0x168   :  { %v1690_v38 = vmax.f32 %v3340_v58, %v2711_v34  ;;  %v1741_v56 = vmax.f32 %v3342_v59, %v2811_v39  ;;  %v1124_v0 = vpop.f32.mrb[59].mxu0  ;;  %v1524_v48 = vpop.f32.mrb[59].mxu1  ;;  %v1889_v36 = vmax.f32 %v1840_v42, 0.0 }
 0x169   :  { %2507 = vst [vmem:[%s3746_s3 + $0x8] sm:$0xff] %v2395_v28   ;;  %v2400_v1 = vpack.c.bf16 %v1888_v44, %v1887_v53  ;;  %v1785_v57 = vmax.f32 %v1687_v26, %v1736_v43  ;;  %v1688_v54 = vmax.f32 %v3344_v60, %v1124_v0  ;;  %v1739_v46 = vmax.f32 %v3346_v61, %v1524_v48 }
 0x16a   :  { %v1787_v47 = vmax.f32 %v1689_v45, %v1738_v29 }
 0x16b   :  { %2508 = vst [vmem:[%s3746_s3 + $0x10] sm:$0xff] %v2400_v1   ;;  %v1841_v55 = vadd.f32 %v3519_v49, %v1785_v57  ;;  %v1786_v58 = vmax.f32 %v1688_v54, %v1737_v40  ;;  %v1788_v59 = vmax.f32 %v1690_v38, %v1739_v46 }
 0x16c   :  { %v1843_v31 = vadd.f32 %v3519_v49, %v1787_v47 }
 0x16d   :  { %v1890_v37 = vmax.f32 %v1841_v55, 0.0  ;;  %v1842_v41 = vadd.f32 %v3519_v49, %v1786_v58  ;;  %v2714_v43 = vpop.f32.mrb[60].mxu0  ;;  %v2814_v50 = vpop.f32.mrb[60].mxu1  ;;  %v1844_v53 = vadd.f32 %v3519_v49, %v1788_v59 }
 0x16e   :  { %v1693_v60 = vmax.f32 %v3368_v8, %v2714_v43  ;;  %v1744_v61 = vmax.f32 %v3370_v9, %v2814_v50  ;;  %v1137_v35 = vpop.f32.mrb[61].mxu0  ;;  %v1537_v51 = vpop.f32.mrb[61].mxu1  ;;  %v1892_v30 = vmax.f32 %v1843_v31, 0.0 }
 0x16f   :  { %v2405_v45 = vpack.c.bf16 %v1890_v37, %v1889_v36  ;;  %v1891_v52 = vmax.f32 %v1842_v41, 0.0  ;;  %v1691_v40 = vmax.f32 %v3348_v62, %v1137_v35  ;;  %v2715_v28 = vpop.f32.mrb[62].mxu0  ;;  %v2815_v44 = vpop.f32.mrb[62].mxu1  ;;  %v1742_v26 = vmax.f32 %v3350_v63, %v1537_v51 }
 0x170   :  { %v1694_v34 = vmax.f32 %v3356_v2, %v2715_v28  ;;  %v1745_v39 = vmax.f32 %v3358_v3, %v2815_v44  ;;  %v1140_v8 = vpop.f32.mrb[63].mxu0  ;;  %v1540_v42 = vpop.f32.mrb[63].mxu1  ;;  %v1893_v1 = vmax.f32 %v1844_v53, 0.0 }
 0x171   :  { %2509 = vst [vmem:[%s3746_s3 + $0x18] sm:$0xff] %v2405_v45   ;;  %v2410_v9 = vpack.c.bf16 %v1892_v30, %v1891_v52  ;;  %v1789_v29 = vmax.f32 %v1691_v40, %v1740_v27  ;;  %v1692_v62 = vmax.f32 %v3360_v4, %v1140_v8  ;;  %v1743_v38 = vmax.f32 %v3362_v5, %v1540_v42 }
 0x172   :  { %v1791_v0 = vmax.f32 %v1693_v60, %v1742_v26 }
 0x173   :  { %2510 = vst [vmem:[%s3746_s3 + $0x20] sm:$0xff] %v2410_v9   ;;  %v1845_v63 = vadd.f32 %v3519_v49, %v1789_v29  ;;  %v1790_v2 = vmax.f32 %v1692_v62, %v1741_v56  ;;  %v1792_v3 = vmax.f32 %v1694_v34, %v1743_v38 }
 0x174   :  { %v1847_v48 = vadd.f32 %v3519_v49, %v1791_v0 }
 0x175   :  { %v1894_v57 = vmax.f32 %v1845_v63, 0.0  ;;  %v1846_v54 = vadd.f32 %v3519_v49, %v1790_v2  ;;  %v2718_v27 = vpop.f32.mrb[64].mxu0  ;;  %v2818_v46 = vpop.f32.mrb[64].mxu1  ;;  %v1848_v41 = vadd.f32 %v3519_v49, %v1792_v3 }
 0x176   :  { %v1697_v4 = vmax.f32 %v3384_v16, %v2718_v27  ;;  %v1748_v5 = vmax.f32 %v3386_v17, %v2818_v46  ;;  %v1153_v47 = vpop.f32.mrb[65].mxu0  ;;  %v1553_v55 = vpop.f32.mrb[65].mxu1  ;;  %v1896_v59 = vmax.f32 %v1847_v48, 0.0 }
 0x177   :  { %v2415_v58 = vpack.c.bf16 %v1894_v57, %v1893_v1  ;;  %v1895_v31 = vmax.f32 %v1846_v54, 0.0  ;;  %v1695_v56 = vmax.f32 %v3364_v6, %v1153_v47  ;;  %v2719_v36 = vpop.f32.mrb[66].mxu0  ;;  %v2819_v37 = vpop.f32.mrb[66].mxu1  ;;  %v1746_v43 = vmax.f32 %v3366_v7, %v1553_v55 }
 0x178   :  { %v1698_v50 = vmax.f32 %v3372_v10, %v2719_v36  ;;  %v1749_v60 = vmax.f32 %v3374_v11, %v2819_v37  ;;  %v1156_v16 = vpop.f32.mrb[67].mxu0  ;;  %v1556_v35 = vpop.f32.mrb[67].mxu1  ;;  %v1897_v40 = vmax.f32 %v1848_v41, 0.0 }
 0x179   :  { %2511 = vst [vmem:[%s3746_s3 + $0x28] sm:$0xff] %v2415_v58   ;;  %v2420_v17 = vpack.c.bf16 %v1896_v59, %v1895_v31  ;;  %v1793_v51 = vmax.f32 %v1695_v56, %v1744_v61  ;;  %v1696_v6 = vmax.f32 %v3376_v12, %v1156_v16  ;;  %v1747_v45 = vmax.f32 %v3378_v13, %v1556_v35  ;;  %v3804_v35 = vld [vmem:[#allocation5_spill] sm:$0xff] }
 0x17a   :  { %v1795_v30 = vmax.f32 %v1697_v4, %v1746_v43 }
 0x17b   :  { %2512 = vst [vmem:[%s3746_s3 + $0x30] sm:$0xff] %v2420_v17   ;;  %v1849_v7 = vadd.f32 %v3519_v49, %v1793_v51  ;;  %v1794_v10 = vmax.f32 %v1696_v6, %v1745_v39  ;;  %v1796_v11 = vmax.f32 %v1698_v50, %v1747_v45  ;;  %v3805_v45 = vld [vmem:[#allocation6_spill] sm:$0xff] }
 0x17c   :  { %v1851_v52 = vadd.f32 %v3519_v49, %v1795_v30  ;;  %v3806_v30 = vld [vmem:[#allocation7_spill] sm:$0xff] }
 0x17d   :  { %v1898_v28 = vmax.f32 %v1849_v7, 0.0  ;;  %v1850_v44 = vadd.f32 %v3519_v49, %v1794_v10  ;;  %v2722_v61 = vpop.f32.mrb[68].mxu0  ;;  %v2822_v53 = vpop.f32.mrb[68].mxu1  ;;  %v1852_v38 = vadd.f32 %v3519_v49, %v1796_v11 }
 0x17e   :  { %v1701_v12 = vmax.f32 %v3400_v24, %v2722_v61  ;;  %v1752_v13 = vmax.f32 %v3402_v25, %v2822_v53  ;;  %v1169_v26 = vpop.f32.mrb[69].mxu0  ;;  %v1569_v34 = vpop.f32.mrb[69].mxu1  ;;  %v1900_v42 = vmax.f32 %v1851_v52, 0.0 }
 0x17f   :  { %v2425_v8 = vpack.c.bf16 %v1898_v28, %v1897_v40  ;;  %v1899_v9 = vmax.f32 %v1850_v44, 0.0  ;;  %v1699_v39 = vmax.f32 %v3380_v14, %v1169_v26  ;;  %v2723_v29 = vpop.f32.mrb[70].mxu0  ;;  %v2823_v62 = vpop.f32.mrb[70].mxu1  ;;  %v1750_v0 = vmax.f32 %v3382_v15, %v1569_v34  ;;  %v3808_v34 = vld [vmem:[#allocation17_spill] sm:$0xff] }
 0x180   :  { %v1702_v63 = vmax.f32 %v3388_v18, %v2723_v29  ;;  %v1753_v2 = vmax.f32 %v3390_v19, %v2823_v62  ;;  %v1172_v24 = vpop.f32.mrb[71].mxu0  ;;  %v1572_v3 = vpop.f32.mrb[71].mxu1  ;;  %v1901_v27 = vmax.f32 %v1852_v38, 0.0  ;;  %v3809_v38 = vld [vmem:[#allocation8_spill] sm:$0xff] }
 0x181   :  { %2513 = vst [vmem:[%s3746_s3 + $0x38] sm:$0xff] %v2425_v8   ;;  %v2430_v25 = vpack.c.bf16 %v1900_v42, %v1899_v9  ;;  %v1797_v48 = vmax.f32 %v1699_v39, %v1748_v5  ;;  %v1700_v14 = vmax.f32 %v3392_v20, %v1172_v24  ;;  %v1751_v1 = vmax.f32 %v3394_v21, %v1572_v3  ;;  %v3810_v3 = vld [vmem:[#allocation9_spill] sm:$0xff] }
 0x182   :  { %v1799_v57 = vmax.f32 %v1701_v12, %v1750_v0 }
 0x183   :  { %2514 = vst [vmem:[%s3746_s3 + $0x40] sm:$0xff] %v2430_v25   ;;  %v1853_v15 = vadd.f32 %v3519_v49, %v1797_v48  ;;  %v1798_v18 = vmax.f32 %v1700_v14, %v1749_v60  ;;  %v1800_v19 = vmax.f32 %v1702_v63, %v1751_v1  ;;  %v3803_v60 = vld [vmem:[#allocation4_spill] sm:$0xff]  ;;  %v3811_v48 = vld [vmem:[#allocation10_spill] sm:$0xff]  ;;  %v3812_v1 = vld [vmem:[#allocation11_spill] sm:$0xff] }
 0x184   :  { %v1855_v54 = vadd.f32 %v3519_v49, %v1799_v57 }
 0x185   :  { %v1902_v46 = vmax.f32 %v1853_v15, 0.0  ;;  %v1854_v4 = vadd.f32 %v3519_v49, %v1798_v18  ;;  %v2726_v5 = vpop.f32.mrb[72].mxu0  ;;  %v2826_v47 = vpop.f32.mrb[72].mxu1  ;;  %v1856_v43 = vadd.f32 %v3519_v49, %v1800_v19 }
 0x186   :  { %v1705_v20 = vmax.f32 %v3416_v32, %v2726_v5  ;;  %v1756_v21 = vmax.f32 %v3418_v33, %v2826_v47  ;;  %v1185_v55 = vpop.f32.mrb[73].mxu0  ;;  %v1585_v58 = vpop.f32.mrb[73].mxu1  ;;  %v1904_v31 = vmax.f32 %v1855_v54, 0.0 }
 0x187   :  { %v2435_v59 = vpack.c.bf16 %v1902_v46, %v1901_v27  ;;  %v1903_v56 = vmax.f32 %v1854_v4, 0.0  ;;  %v1703_v36 = vmax.f32 %v3396_v22, %v1185_v55  ;;  %v2727_v37 = vpop.f32.mrb[74].mxu0  ;;  %v2827_v41 = vpop.f32.mrb[74].mxu1  ;;  %v1754_v50 = vmax.f32 %v3398_v23, %v1585_v58  ;;  %v3813_v27 = vld [vmem:[#allocation12_spill] sm:$0xff]  ;;  %v3814_v4 = vld [vmem:[#allocation13_spill] sm:$0xff] }
 0x188   :  { %v1706_v16 = vmax.f32 %v3803_v60, %v2727_v37  ;;  %v1757_v17 = vmax.f32 %v3804_v35, %v2827_v41  ;;  %v1188_v32 = vpop.f32.mrb[75].mxu0  ;;  %v1588_v51 = vpop.f32.mrb[75].mxu1  ;;  %v1905_v28 = vmax.f32 %v1856_v43, 0.0  ;;  %v3815_v41 = vld [vmem:[#allocation24_spill] sm:$0xff] }
 0x189   :  { %2515 = vst [vmem:[%s3746_s3 + $0x48] sm:$0xff] %v2435_v59   ;;  %v2440_v33 = vpack.c.bf16 %v1904_v31, %v1903_v56  ;;  %v1801_v6 = vmax.f32 %v1703_v36, %v1752_v13  ;;  %v1704_v22 = vmax.f32 %v3805_v45, %v1188_v32  ;;  %v1755_v7 = vmax.f32 %v3806_v30, %v1588_v51  ;;  %v3807_v13 = vld [vmem:[#allocation16_spill] sm:$0xff] }
 0x18a   :  { %v1803_v10 = vmax.f32 %v1705_v20, %v1754_v50  ;;  %v3816_v50 = vld [vmem:[#allocation25_spill] sm:$0xff] }
 0x18b   :  { %2516 = vst [vmem:[%s3746_s3 + $0x50] sm:$0xff] %v2440_v33   ;;  %v1857_v23 = vadd.f32 %v3519_v49, %v1801_v6  ;;  %v1802_v11 = vmax.f32 %v1704_v22, %v1753_v2  ;;  %v1804_v52 = vmax.f32 %v1706_v16, %v1755_v7  ;;  %v3817_v6 = vld [vmem:[#allocation14_spill] sm:$0xff]  ;;  %v3818_v7 = vld [vmem:[#allocation15_spill] sm:$0xff] }
 0x18c   :  { %v1859_v40 = vadd.f32 %v3519_v49, %v1803_v10 }
 0x18d   :  { %v1906_v44 = vmax.f32 %v1857_v23, 0.0  ;;  %v1858_v61 = vadd.f32 %v3519_v49, %v1802_v11  ;;  %v2730_v53 = vpop.f32.mrb[76].mxu0  ;;  %v2830_v12 = vpop.f32.mrb[76].mxu1  ;;  %v1860_v24 = vadd.f32 %v3519_v49, %v1804_v52  ;;  %v3819_v23 = vld [vmem:[#allocation18_spill] sm:$0xff]  ;;  %v3820_v52 = vld [vmem:[#allocation19_spill] sm:$0xff] }
 0x18e   :  { %v1709_v26 = vmax.f32 %v3807_v13, %v2730_v53  ;;  %v1760_v8 = vmax.f32 %v3808_v34, %v2830_v12  ;;  %v1201_v42 = vpop.f32.mrb[77].mxu0  ;;  %v1601_v9 = vpop.f32.mrb[77].mxu1  ;;  %v1908_v29 = vmax.f32 %v1859_v40, 0.0  ;;  %v3821_v12 = vld [vmem:[#allocation20_spill] sm:$0xff] }
 0x18f   :  { %v2445_v39 = vpack.c.bf16 %v1906_v44, %v1905_v28  ;;  %v1907_v62 = vmax.f32 %v1858_v61, 0.0  ;;  %v1707_v0 = vmax.f32 %v3809_v38, %v1201_v42  ;;  %v2731_v63 = vpop.f32.mrb[78].mxu0  ;;  %v2831_v2 = vpop.f32.mrb[78].mxu1  ;;  %v1758_v25 = vmax.f32 %v3810_v3, %v1601_v9 }
 0x190   :  { %v1710_v14 = vmax.f32 %v3811_v48, %v2731_v63  ;;  %v1761_v57 = vmax.f32 %v3812_v1, %v2831_v2  ;;  %v1204_v15 = vpop.f32.mrb[79].mxu0  ;;  %v1604_v18 = vpop.f32.mrb[79].mxu1  ;;  %v1909_v31 = vmax.f32 %v1860_v24, 0.0  ;;  %v3823_v24 = vld [vmem:[#allocation32_spill] sm:$0xff] }
 0x191   :  { %2517 = vst [vmem:[%s3746_s3 + $0x58] sm:$0xff] %v2445_v39   ;;  %v2450_v19 = vpack.c.bf16 %v1908_v29, %v1907_v62  ;;  %v1805_v54 = vmax.f32 %v1707_v0, %v1756_v21  ;;  %v1708_v46 = vmax.f32 %v3813_v27, %v1204_v15  ;;  %v1759_v5 = vmax.f32 %v3814_v4, %v1604_v18 }
 0x192   :  { %v1807_v47 = vmax.f32 %v1709_v26, %v1758_v25  ;;  %v3822_v26 = vld [vmem:[#allocation21_spill] sm:$0xff] }
 0x193   :  { %2518 = vst [vmem:[%s3746_s3 + $0x60] sm:$0xff] %v2450_v19   ;;  %v1861_v20 = vadd.f32 %v3519_v49, %v1805_v54  ;;  %v1806_v55 = vmax.f32 %v1708_v46, %v1757_v17  ;;  %v1808_v58 = vmax.f32 %v1710_v14, %v1759_v5  ;;  %v3824_v25 = vld [vmem:[#allocation33_spill] sm:$0xff]  ;;  %v3825_v54 = vld [vmem:[#allocation22_spill] sm:$0xff]  ;;  %v3826_v5 = vld [vmem:[#allocation23_spill] sm:$0xff] }
 0x194   :  { %v1863_v59 = vadd.f32 %v3519_v49, %v1807_v47 }
 0x195   :  { %v1910_v56 = vmax.f32 %v1861_v20, 0.0  ;;  %v1862_v36 = vadd.f32 %v3519_v49, %v1806_v55  ;;  %v2734_v21 = vpop.f32.mrb[80].mxu0  ;;  %v2834_v37 = vpop.f32.mrb[80].mxu1  ;;  %v1864_v30 = vadd.f32 %v3519_v49, %v1808_v58  ;;  %v3827_v20 = vld [vmem:[#allocation26_spill] sm:$0xff]  ;;  %v3828_v58 = vld [vmem:[#allocation27_spill] sm:$0xff] }
 0x196   :  { %v1713_v43 = vmax.f32 %v3815_v41, %v2734_v21  ;;  %v1764_v60 = vmax.f32 %v3816_v50, %v2834_v37  ;;  %v1217_v16 = vpop.f32.mrb[81].mxu0  ;;  %v1617_v35 = vpop.f32.mrb[81].mxu1  ;;  %v1912_v51 = vmax.f32 %v1863_v59, 0.0  ;;  %v3829_v37 = vld [vmem:[#allocation28_spill] sm:$0xff] }
 0x197   :  { %v2455_v32 = vpack.c.bf16 %v1910_v56, %v1909_v31  ;;  %v1911_v33 = vmax.f32 %v1862_v36, 0.0  ;;  %v1711_v17 = vmax.f32 %v3817_v6, %v1217_v16  ;;  %v2735_v45 = vpop.f32.mrb[82].mxu0  ;;  %v2835_v22 = vpop.f32.mrb[82].mxu1  ;;  %v1762_v10 = vmax.f32 %v3818_v7, %v1617_v35 }
 0x198   :  { %v1714_v11 = vmax.f32 %v3819_v23, %v2735_v45  ;;  %v1765_v40 = vmax.f32 %v3820_v52, %v2835_v22  ;;  %v1220_v28 = vpop.f32.mrb[83].mxu0  ;;  %v1620_v44 = vpop.f32.mrb[83].mxu1  ;;  %v1913_v38 = vmax.f32 %v1864_v30, 0.0  ;;  %v3831_v30 = vld [vmem:[#allocation40_spill] sm:$0xff] }
 0x199   :  { %2519 = vst [vmem:[%s3746_s3 + $0x68] sm:$0xff] %v2455_v32   ;;  %v2460_v61 = vpack.c.bf16 %v1912_v51, %v1911_v33  ;;  %v1809_v53 = vmax.f32 %v1711_v17, %v1760_v8  ;;  %v1712_v13 = vmax.f32 %v3821_v12, %v1220_v28  ;;  %v1763_v34 = vmax.f32 %v3822_v26, %v1620_v44 }
 0x19a   :  { %v1811_v42 = vmax.f32 %v1713_v43, %v1762_v10  ;;  %v3830_v43 = vld [vmem:[#allocation29_spill] sm:$0xff] }
 0x19b   :  { %2520 = vst [vmem:[%s3746_s3 + $0x70] sm:$0xff] %v2460_v61   ;;  %v1865_v9 = vadd.f32 %v3519_v49, %v1809_v53  ;;  %v1810_v39 = vmax.f32 %v1712_v13, %v1761_v57  ;;  %v1812_v29 = vmax.f32 %v1714_v11, %v1763_v34  ;;  %v3832_v10 = vld [vmem:[#allocation41_spill] sm:$0xff]  ;;  %v3833_v53 = vld [vmem:[#allocation30_spill] sm:$0xff]  ;;  %v3834_v34 = vld [vmem:[#allocation31_spill] sm:$0xff] }
 0x19c   :  { %v1867_v62 = vadd.f32 %v3519_v49, %v1811_v42 }
 0x19d   :  { %v1914_v0 = vmax.f32 %v1865_v9, 0.0  ;;  %v1866_v63 = vadd.f32 %v3519_v49, %v1810_v39  ;;  %v2738_v8 = vpop.f32.mrb[84].mxu0  ;;  %v2838_v2 = vpop.f32.mrb[84].mxu1  ;;  %v1868_v4 = vadd.f32 %v3519_v49, %v1812_v29  ;;  %v3835_v9 = vld [vmem:[#allocation34_spill] sm:$0xff]  ;;  %v3836_v29 = vld [vmem:[#allocation35_spill] sm:$0xff] }
 0x19e   :  { %v1717_v3 = vmax.f32 %v3823_v24, %v2738_v8  ;;  %v1768_v48 = vmax.f32 %v3824_v25, %v2838_v2  ;;  %v1233_v14 = vpop.f32.mrb[85].mxu0  ;;  %v1633_v1 = vpop.f32.mrb[85].mxu1  ;;  %v1916_v18 = vmax.f32 %v1867_v62, 0.0  ;;  %v3837_v2 = vld [vmem:[#allocation36_spill] sm:$0xff] }
 0x19f   :  { %v2465_v15 = vpack.c.bf16 %v1914_v0, %v1913_v38  ;;  %v1915_v19 = vmax.f32 %v1866_v63, 0.0  ;;  %v1715_v57 = vmax.f32 %v3825_v54, %v1233_v14  ;;  %v2739_v27 = vpop.f32.mrb[86].mxu0  ;;  %v2839_v46 = vpop.f32.mrb[86].mxu1  ;;  %v1766_v47 = vmax.f32 %v3826_v5, %v1633_v1 }
 0x1a0   :  { %v1718_v55 = vmax.f32 %v3827_v20, %v2739_v27  ;;  %v1769_v59 = vmax.f32 %v3828_v58, %v2839_v46  ;;  %v1236_v31 = vpop.f32.mrb[87].mxu0  ;;  %v1636_v56 = vpop.f32.mrb[87].mxu1  ;;  %v1917_v6 = vmax.f32 %v1868_v4, 0.0  ;;  %v3839_v4 = vld [vmem:[#allocation48_spill] sm:$0xff] }
 0x1a1   :  { %2521 = vst [vmem:[%s3746_s3 + $0x78] sm:$0xff] %v2465_v15   ;;  %v2470_v36 = vpack.c.bf16 %v1916_v18, %v1915_v19  ;;  %v1813_v21 = vmax.f32 %v1715_v57, %v1764_v60  ;;  %v1716_v41 = vmax.f32 %v3829_v37, %v1236_v31  ;;  %v1767_v50 = vmax.f32 %v3830_v43, %v1636_v56 }
 0x1a2   :  { %v1815_v16 = vmax.f32 %v1717_v3, %v1766_v47  ;;  %v3838_v3 = vld [vmem:[#allocation37_spill] sm:$0xff] }
 0x1a3   :  { %2522 = vst [vmem:[%s3746_s3 + $0x80] sm:$0xff] %v2470_v36   ;;  %v1869_v35 = vadd.f32 %v3519_v49, %v1813_v21  ;;  %v1814_v32 = vmax.f32 %v1716_v41, %v1765_v40  ;;  %v1816_v51 = vmax.f32 %v1718_v55, %v1767_v50  ;;  %v3840_v47 = vld [vmem:[#allocation49_spill] sm:$0xff]  ;;  %v3841_v21 = vld [vmem:[#allocation38_spill] sm:$0xff]  ;;  %v3842_v50 = vld [vmem:[#allocation39_spill] sm:$0xff] }
 0x1a4   :  { %v1871_v33 = vadd.f32 %v3519_v49, %v1815_v16 }
 0x1a5   :  { %v1918_v17 = vmax.f32 %v1869_v35, 0.0  ;;  %v1870_v45 = vadd.f32 %v3519_v49, %v1814_v32  ;;  %v2742_v60 = vpop.f32.mrb[88].mxu0  ;;  %v2842_v22 = vpop.f32.mrb[88].mxu1  ;;  %v1872_v26 = vadd.f32 %v3519_v49, %v1816_v51  ;;  %v3843_v35 = vld [vmem:[#allocation42_spill] sm:$0xff]  ;;  %v3844_v51 = vld [vmem:[#allocation43_spill] sm:$0xff] }
 0x1a6   :  { %v1721_v7 = vmax.f32 %v3831_v30, %v2742_v60  ;;  %v1772_v23 = vmax.f32 %v3832_v10, %v2842_v22  ;;  %v1249_v11 = vpop.f32.mrb[89].mxu0  ;;  %v1649_v52 = vpop.f32.mrb[89].mxu1  ;;  %v1920_v44 = vmax.f32 %v1871_v33, 0.0  ;;  %v3845_v22 = vld [vmem:[#allocation44_spill] sm:$0xff] }
 0x1a7   :  { %v2475_v28 = vpack.c.bf16 %v1918_v17, %v1917_v6  ;;  %v1919_v61 = vmax.f32 %v1870_v45, 0.0  ;;  %v1719_v40 = vmax.f32 %v3833_v53, %v1249_v11  ;;  %v2743_v12 = vpop.f32.mrb[90].mxu0  ;;  %v2843_v13 = vpop.f32.mrb[90].mxu1  ;;  %v1770_v42 = vmax.f32 %v3834_v34, %v1649_v52 }
 0x1a8   :  { %v1722_v39 = vmax.f32 %v3835_v9, %v2743_v12  ;;  %v1773_v62 = vmax.f32 %v3836_v29, %v2843_v13  ;;  %v1252_v38 = vpop.f32.mrb[91].mxu0  ;;  %v1652_v0 = vpop.f32.mrb[91].mxu1  ;;  %v1921_v54 = vmax.f32 %v1872_v26, 0.0  ;;  %v3847_v13 = vld [vmem:[#allocation47_spill] sm:$0xff]  ;;  %v3848_v29 = vld [vmem:[#allocation46_spill] sm:$0xff] }
 0x1a9   :  { %2523 = vst [vmem:[%s3746_s3 + $0x88] sm:$0xff] %v2475_v28   ;;  %v2480_v63 = vpack.c.bf16 %v1920_v44, %v1919_v61  ;;  %v1817_v8 = vmax.f32 %v1719_v40, %v1768_v48  ;;  %v1720_v24 = vmax.f32 %v3837_v2, %v1252_v38  ;;  %v1771_v25 = vmax.f32 %v3838_v3, %v1652_v0 }
 0x1aa   :  { %v1819_v14 = vmax.f32 %v1721_v7, %v1770_v42  ;;  %v3846_v7 = vld [vmem:[#allocation45_spill] sm:$0xff] }
 0x1ab   :  { %2524 = vst [vmem:[%s3746_s3 + $0x90] sm:$0xff] %v2480_v63   ;;  %v1873_v1 = vadd.f32 %v3519_v49, %v1817_v8  ;;  %v1818_v15 = vmax.f32 %v1720_v24, %v1769_v59  ;;  %v1820_v18 = vmax.f32 %v1722_v39, %v1771_v25  ;;  %v3849_v63 = vld [vmem:[#allocation2_spill] sm:$0xff]  ;;  %v3850_v8 = vld [vmem:[#allocation53_spill] sm:$0xff]  ;;  %v3852_v24 = vld [vmem:[#allocation52_spill] sm:$0xff] }
 0x1ac   :  { %v1875_v19 = vadd.f32 %v3519_v49, %v1819_v14 }
 0x1ad   :  { %v1922_v57 = vmax.f32 %v1873_v1, 0.0  ;;  %v1874_v27 = vadd.f32 %v3519_v49, %v1818_v15  ;;  %v2746_v48 = vpop.f32.mrb[92].mxu0  ;;  %v2846_v46 = vpop.f32.mrb[92].mxu1  ;;  %v1876_v43 = vadd.f32 %v3519_v49, %v1820_v18  ;;  %v3853_v18 = vld [vmem:[#allocation51_spill] sm:$0xff] }
 0x1ae   :  { %v1725_v5 = vmax.f32 %v3839_v4, %v2746_v48  ;;  %v1776_v20 = vmax.f32 %v3840_v47, %v2846_v46  ;;  %v1265_v55 = vpop.f32.mrb[93].mxu0  ;;  %v1665_v58 = vpop.f32.mrb[93].mxu1  ;;  %v1924_v56 = vmax.f32 %v1875_v19, 0.0 }
 0x1af   :  { %v2485_v31 = vpack.c.bf16 %v1922_v57, %v1921_v54  ;;  %v1923_v36 = vmax.f32 %v1874_v27, 0.0  ;;  %v1723_v59 = vmax.f32 %v3841_v21, %v1265_v55  ;;  %v2747_v37 = vpop.f32.mrb[94].mxu0  ;;  %v2847_v41 = vpop.f32.mrb[94].mxu1  ;;  %v1774_v16 = vmax.f32 %v3842_v50, %v1665_v58  ;;  %v3854_v57 = vld [vmem:[#allocation3_spill] sm:$0xff]  ;;  %v3855_v27 = vld [vmem:[#allocation50_spill] sm:$0xff] }
 0x1b0   :  { %v1726_v32 = vmax.f32 %v3843_v35, %v2747_v37  ;;  %v1777_v33 = vmax.f32 %v3844_v51, %v2847_v41  ;;  %v1268_v6 = vpop.f32.mrb[95].mxu0  ;;  %v1668_v17 = vpop.f32.mrb[95].mxu1  ;;  %v1925_v53 = vmax.f32 %v1876_v43, 0.0  ;;  %v3856_v48 = vmax.f32 %v3854_v57, %v3855_v27 }
 0x1b1   :  { %2525 = vst [vmem:[%s3746_s3 + $0x98] sm:$0xff] %v2485_v31   ;;  %v2490_v45 = vpack.c.bf16 %v1924_v56, %v1923_v36  ;;  %v1821_v60 = vmax.f32 %v1723_v59, %v1772_v23  ;;  %v1724_v30 = vmax.f32 %v3845_v22, %v1268_v6  ;;  %v1775_v10 = vmax.f32 %v3846_v7, %v1668_v17 }
 0x1b2   :  { %v1823_v11 = vmax.f32 %v1725_v5, %v1774_v16 }
 0x1b3   :  { %2526 = vst [vmem:[%s3746_s3 + $0xa0] sm:$0xff] %v2490_v45   ;;  %v1877_v52 = vadd.f32 %v3519_v49, %v1821_v60  ;;  %v1822_v28 = vmax.f32 %v1724_v30, %v1773_v62  ;;  %v1824_v44 = vmax.f32 %v1726_v32, %v1775_v10  ;;  %v3851_v62 = vmax.f32 %v3849_v63, %v3850_v8 }
 0x1b4   :  { %v1879_v61 = vadd.f32 %v3519_v49, %v1823_v11 }
 0x1b5   :  { %v1926_v40 = vmax.f32 %v1877_v52, 0.0  ;;  %v1878_v12 = vadd.f32 %v3519_v49, %v1822_v28  ;;  %v2750_v23 = vpop.f32.mrb[96].mxu0  ;;  %v1880_v1 = vadd.f32 %v3519_v49, %v1824_v44 }
 0x1b6   :  { %v1729_v26 = vmax.f32 %v2750_v23, %v3847_v13  ;;  %v1281_v34 = vpop.f32.mrb[97].mxu0  ;;  %v1928_v9 = vmax.f32 %v1879_v61, 0.0 }
 0x1b7   :  { %v2495_v42 = vpack.c.bf16 %v1926_v40, %v1925_v53  ;;  %v1927_v39 = vmax.f32 %v1878_v12, 0.0  ;;  %v1727_v38 = vmax.f32 %v3848_v29, %v1281_v34  ;;  %v2751_v0 = vpop.f32.mrb[98].mxu0  ;;  %v1929_v55 = vmax.f32 %v1880_v1, 0.0 }
 0x1b8   :  { %v1778_v2 = vmax.f32 %v3851_v62, %v1729_v26  ;;  %v1730_v3 = vmax.f32 %v2751_v0, %v3852_v24  ;;  %v1284_v25 = vpop.f32.mrb[99].mxu0 }
 0x1b9   :  { %2527 = vst [vmem:[%s3746_s3 + $0xa8] sm:$0xff] %v2495_v42   ;;  %v2500_v14 = vpack.c.bf16 %v1928_v9, %v1927_v39  ;;  %v1825_v15 = vmax.f32 %v1727_v38, %v1776_v20  ;;  %v1728_v19 = vmax.f32 %v3853_v18, %v1284_v25 }
 0x1ba   :  { %v1834_v54 = vadd.f32 %v3519_v49, %v1778_v2  ;;  %v1779_v46 = vmax.f32 %v3856_v48, %v1730_v3 }
 0x1bb   :  { %2528 = vst [vmem:[%s3746_s3 + $0xb0] sm:$0xff] %v2500_v14   ;;  %v1881_v4 = vadd.f32 %v3519_v49, %v1825_v15  ;;  %v1826_v5 = vmax.f32 %v1728_v19, %v1777_v33 }
 0x1bc   :  { %v1835_v47 = vadd.f32 %v3519_v49, %v1779_v46  ;;  %v1883_v31 = vmax.f32 %v1834_v54, 0.0 }
 0x1bd   :  { %v1930_v58 = vmax.f32 %v1881_v4, 0.0  ;;  %v1882_v20 = vadd.f32 %v3519_v49, %v1826_v5 }
 0x1be   :  { %v1884_v56 = vmax.f32 %v1835_v47, 0.0 }
 0x1bf   :  { %v2505_v36 = vpack.c.bf16 %v1930_v58, %v1929_v55  ;;  %v1931_v21 = vmax.f32 %v1882_v20, 0.0 }
 0x1c0   :  { %v2390_v59 = vpack.c.bf16 %v1884_v56, %v1883_v31 }
 0x1c1   :  { %2529 = vst [vmem:[%s3746_s3 + $0xb8] sm:$0xff] %v2505_v36   ;;  %v2386_v37 = vpack.c.bf16 %v1931_v21, %v1931_v21 }
 0x1c2   :  { %2391 = vst [vmem:[%s3746_s3] sm:$0xff] %v2390_v59  }
 0x1c3   :  { %2177 = vst [vmem:[%s3746_s3 + $0xc0] sm:$0xf] %v2386_v37 }

// kernel: svhn_classifier_forward.3
= control target key start
LH: loop header
LB: loop body
LE: loop exit
PB: predicated region body
PF: predicated region fallthrough
CT: control target
= control target key end

     0   :  { %s2132_s0 = inlined_call_operand.vmem [shape: bf16[224,256], index: 0, kind: input, shape index: {}]   ;;  %s2133_s1 = inlined_call_operand.vmem [shape: bf16[256,20], index: 1, kind: input, shape index: {}]   ;;  %s2134_s2 = inlined_call_operand.vmem [shape: f32[1,20], index: 2, kind: input, shape index: {}]   ;;  %s2135_s3 = inlined_call_operand.vmem [shape: bf16[512,128], index: 3, kind: input, shape index: {}]   ;;  %s2136_s4 = inlined_call_operand.vmem [shape: f32[1,128], index: 4, kind: input, shape index: {}]   ;;  %s2137_s5 = inlined_call_operand.vmem [shape: bf16[128,128], index: 5, kind: input, shape index: {}]   ;;  %s2138_s6 = inlined_call_operand.vmem [shape: f32[1,128], index: 6, kind: input, shape index: {}]   ;;  %s2139_s7 = inlined_call_operand.hbm [shape: f32[2,128], index: 7, kind: output, shape index: {}]  }
   0x1   :  { %v1565_v0 = vld [vmem:[%s2133_s1 + $0x40] sm:$0xff]   ;;  %v1567_v2 = vld [vmem:[%s2133_s1 + $0x48] sm:$0xff]   ;;  %v1569_v4 = vld [vmem:[%s2133_s1 + $0x50] sm:$0xff]  }
   0x2   :  { %v1566_v1 = vld [vmem:[%s2133_s1] sm:$0xff]   ;;  %1364 = vmatprep.subr.bf16.mxu0 %v1565_v0  ;;  %v1568_v3 = vld [vmem:[%s2133_s1 + $0x8] sm:$0xff]   ;;  %v1570_v5 = vld [vmem:[%s2133_s1 + $0x10] sm:$0xff]  }
   0x3   :  { %1365 = vmatpush3.bf16.msra.mxu0 %v1566_v1  ;;  %v1571_v6 = vld [vmem:[%s2133_s1 + $0x58] sm:$0xff]   ;;  %v1573_v8 = vld [vmem:[%s2133_s1 + $0x60] sm:$0xff]   ;;  %v1575_v10 = vld [vmem:[%s2133_s1 + $0x68] sm:$0xff]  }
   0x4   :  { %1366 = vmatprep.subr.bf16.mxu0 %v1567_v2  ;;  %v1572_v7 = vld [vmem:[%s2133_s1 + $0x18] sm:$0xff]   ;;  %v1574_v9 = vld [vmem:[%s2133_s1 + $0x20] sm:$0xff]   ;;  %v1576_v12 = vld [vmem:[%s2133_s1 + $0x28] sm:$0xff]  }
   0x5   :  { %v1583_v11 = vld [vmem:[%s2132_s0 + $0x4] ss:$8 sps:$4 sm:$0xff]   ;;  %v1577_v13 = vld [vmem:[%s2133_s1 + $0x70] sm:$0xff]   ;;  %v1579_v15 = vld [vmem:[%s2133_s1 + $0x78] sm:$0xff]  }
   0x6   :  { %356 = vmatprep.mubr.bf16.mxu0 %v1583_v11  ;;  %v1578_v14 = vld [vmem:[%s2133_s1 + $0x30] sm:$0xff]   ;;  %v1580_v16 = vld [vmem:[%s2133_s1 + $0x38] sm:$0xff]   ;;  %v1581_v17 = vld [vmem:[%s2132_s0] ss:$8 sps:$4 sm:$0xff]  }
   0x7   :  { %1367 = vmatpush3.bf16.msra.mxu0 %v1568_v3  ;;  %v1584_v18 = vld [vmem:[%s2132_s0 + $0x14] ss:$8 sps:$4 sm:$0xff]   ;;  %v1586_v19 = vld [vmem:[%s2132_s0 + $0x10] ss:$8 sps:$4 sm:$0xff]   ;;  %v1587_v20 = vld [vmem:[%s2132_s0 + $0x24] ss:$8 sps:$4 sm:$0xff]  }
   0x8   :  { %1368 = vmatprep.subr.bf16.mxu0 %v1569_v4  ;;  %v1589_v21 = vld [vmem:[%s2132_s0 + $0x20] ss:$8 sps:$4 sm:$0xff]   ;;  %v1590_v22 = vld [vmem:[%s2132_s0 + $0x34] ss:$8 sps:$4 sm:$0xff]   ;;  %v1592_v23 = vld [vmem:[%s2132_s0 + $0x30] ss:$8 sps:$4 sm:$0xff]  }
   0x9   :  { %v1593_v24 = vld [vmem:[%s2132_s0 + $0x44] ss:$8 sps:$4 sm:$0xff]  }
   0xb   :  { %1369 = vmatpush3.bf16.msra.mxu0 %v1570_v5 }
   0xc   :  { %1370 = vmatprep.subr.bf16.mxu0 %v1571_v6 }
   0xf   :  { %1371 = vmatpush3.bf16.msra.mxu0 %v1572_v7 }
  0x10   :  { %1372 = vmatprep.subr.bf16.mxu0 %v1573_v8 }
  0x13   :  { %1373 = vmatpush3.bf16.msra.mxu0 %v1574_v9 }
  0x14   :  { %1374 = vmatprep.subr.bf16.mxu0 %v1575_v10 }
  0x17   :  { %1375 = vmatpush3.bf16.msra.mxu0 %v1576_v12 }
  0x18   :  { %1376 = vmatprep.subr.bf16.mxu0 %v1577_v13 }
  0x1b   :  { %1377 = vmatpush3.bf16.msra.mxu0 %v1578_v14 }
  0x1c   :  { %1378 = vmatprep.subr.bf16.mxu0 %v1579_v15 }
  0x1f   :  { %1379 = vmatpush3.bf16.msra.mxu0 %v1580_v16 }
  0x22   :  { %357 = vmatmul.mubr.bf16.vlgmr.msra.gmra.mrb[0].mxu0 %v1581_v17 }
  0x23   :  { %364 = vmatprep.mubr.bf16.mxu0 %v1584_v18 }
  0x2a   :  { %365 = vmatmul.mubr.bf16.gmra.mrb[4].mxu0 %v1586_v19 }
  0x2b   :  { %372 = vmatprep.mubr.bf16.mxu0 %v1587_v20 }
  0x32   :  { %373 = vmatmul.mubr.bf16.gmra.mrb[8].mxu0 %v1589_v21 }
  0x33   :  { %380 = vmatprep.mubr.bf16.mxu0 %v1590_v22 }
  0x3a   :  { %381 = vmatmul.mubr.bf16.gmra.mrb[12].mxu0 %v1592_v23 }
  0x3b   :  { %388 = vmatprep.mubr.bf16.mxu0 %v1593_v24 }
  0x3c   :  { %12 = vsyncpa [#allocation4], 0  ;;  %v1595_v25 = vld [vmem:[%s2132_s0 + $0x40] ss:$8 sps:$4 sm:$0xff]   ;;  %v1596_v26 = vld [vmem:[%s2132_s0 + $0x54] ss:$8 sps:$4 sm:$0xff]  }
  0x3d   :  { %v1598_v27 = vld [vmem:[%s2132_s0 + $0x50] ss:$8 sps:$4 sm:$0xff]   ;;  %v1599_v28 = vld [vmem:[%s2132_s0 + $0x64] ss:$8 sps:$4 sm:$0xff]   ;;  %v1601_v29 = vld [vmem:[%s2132_s0 + $0x60] ss:$8 sps:$4 sm:$0xff]  }
  0x3e   :  { %v1602_v30 = vld [vmem:[%s2132_s0 + $0x74] ss:$8 sps:$4 sm:$0xff]   ;;  %v1604_v31 = vld [vmem:[%s2132_s0 + $0x70] ss:$8 sps:$4 sm:$0xff]   ;;  %v1605_v32 = vld [vmem:[%s2132_s0 + $0x84] ss:$8 sps:$4 sm:$0xff]  }
  0x3f   :  { %v1607_v33 = vld [vmem:[%s2132_s0 + $0x80] ss:$8 sps:$4 sm:$0xff]   ;;  %v1608_v34 = vld [vmem:[%s2132_s0 + $0x94] ss:$8 sps:$4 sm:$0xff]   ;;  %v1610_v35 = vld [vmem:[%s2132_s0 + $0x90] ss:$8 sps:$4 sm:$0xff]  }
  0x40   :  { %v1611_v36 = vld [vmem:[%s2132_s0 + $0xa4] ss:$8 sps:$4 sm:$0xff]   ;;  %v1613_v37 = vld [vmem:[%s2132_s0 + $0xa0] ss:$8 sps:$4 sm:$0xff]   ;;  %v1614_v38 = vld [vmem:[%s2132_s0 + $0xb4] ss:$8 sps:$4 sm:$0xff]  }
  0x41   :  { %v1616_v39 = vld [vmem:[%s2132_s0 + $0xb0] ss:$8 sps:$4 sm:$0xff]   ;;  %v1617_v40 = vld [vmem:[%s2132_s0 + $0xc4] ss:$8 sps:$4 sm:$0xff]   ;;  %v1619_v41 = vld [vmem:[%s2132_s0 + $0xc0] ss:$8 sps:$4 sm:$0xff]  }
  0x42   :  { %389 = vmatmul.mubr.bf16.gmra.mrb[16].mxu0 %v1595_v25  ;;  %v1620_v42 = vld [vmem:[%s2132_s0 + $0xd4] ss:$8 sps:$4 sm:$0xff]   ;;  %v1622_v43 = vld [vmem:[%s2132_s0 + $0xd0] ss:$8 sps:$4 sm:$0xff]   ;;  %v1692_v44 = vmov 0.0   ;;  %vm512_vm0 = vcmask 156672  }
  0x43   :  { %396 = vmatprep.mubr.bf16.mxu0 %v1596_v26  ;;  %511 = vst [vmem:[#allocation2] sm:$0xff] %v1692_v44  ;;  %s1695_s19 = smov 60   ;;  %s1696_s1 = smov 40   ;;  %vm526_vm1 = vcmask 320672   ;;  %vm539_vm2 = vcmask 484672   ;;  %vm545_vm3 = vcmask 648672  }
  0x44   :  { %s1697_s20 = smov 120   ;;  %s1698_s21 = smov 80   ;;  %vm558_vm4 = vcmask 812672   ;;  %vm580_vm5 = vcmask 1042368   ;;  %vm581_vm6 = vcmask 93186   ;;  %vm577_vm7 = vcmask 982016  }
  0x45   :  { %s1699_s22 = smov 100   ;;  %s1700_s23 = smov 12   ;;  %vm564_vm8 = vcmask 976672   ;;  %vm582_vm9 = vmor %vm581_vm6, %vm580_vm5  ;;  %vm588_vm10 = vcmask 255072   ;;  %vm601_vm11 = vcmask 419072   ;;  %vm607_vm12 = vcmask 583072  }
  0x46   :  { %s1701_s24 = smov 32   ;;  %s1702_s29 = smov 52   ;;  %vm620_vm13 = vcmask 747072   ;;  %vm626_vm14 = vcmask 911072   ;;  %vm642_vm15 = vcmask 1042304   ;;  %vm669_vm5 = vcmask 517472  }
  0x47   :  { %s1703_s30 = smov 92   ;;  %s1704_s12 = smov 72   ;;  %vm682_vm6 = vcmask 681472  }
  0x48   :  { %s1705_s13 = smov 112   ;;  %s1706_s0 = smov 4  }
  0x49   :  { %s1707_s18 = smov 24   ;;  %s1710_s27 = smov 104  }
  0x4a   :  { %397 = vmatmul.mubr.bf16.gmra.mrb[20].mxu0 %v1598_v27  ;;  %s1711_s9 = smov 84   ;;  %s1713_s15 = smov 16  }
  0x4b   :  { %404 = vmatprep.mubr.bf16.mxu0 %v1599_v28 }
  0x52   :  { %405 = vmatmul.mubr.bf16.gmra.mrb[24].mxu0 %v1601_v29 }
  0x53   :  { %412 = vmatprep.mubr.bf16.mxu0 %v1602_v30 }
  0x5a   :  { %413 = vmatmul.mubr.bf16.gmra.mrb[28].mxu0 %v1604_v31 }
  0x5b   :  { %420 = vmatprep.mubr.bf16.mxu0 %v1605_v32 }
  0x62   :  { %421 = vmatmul.mubr.bf16.gmra.mrb[32].mxu0 %v1607_v33 }
  0x63   :  { %428 = vmatprep.mubr.bf16.mxu0 %v1608_v34 }
  0x6a   :  { %429 = vmatmul.mubr.bf16.gmra.mrb[36].mxu0 %v1610_v35 }
  0x6b   :  { %436 = vmatprep.mubr.bf16.mxu0 %v1611_v36 }
  0x72   :  { %437 = vmatmul.mubr.bf16.gmra.mrb[40].mxu0 %v1613_v37 }
  0x73   :  { %444 = vmatprep.mubr.bf16.mxu0 %v1614_v38 }
  0x7a   :  { %445 = vmatmul.mubr.bf16.gmra.mrb[44].mxu0 %v1616_v39 }
  0x7b   :  { %452 = vmatprep.mubr.bf16.mxu0 %v1617_v40 }
  0x82   :  { %453 = vmatmul.mubr.bf16.gmra.mrb[48].mxu0 %v1619_v41 }
  0x83   :  { %460 = vmatprep.mubr.bf16.mxu0 %v1620_v42 }
  0x8a   :  { %461 = vmatmul.mubr.bf16.gmra.mrb[52].mxu0 %v1622_v43 }
  0xf5   :  { %v1380_v45 = vpop.f32.mrb[0].mxu0 }
  0xf6   :  { %v1381_v46 = vpop.f32.mrb[1].mxu0 }
  0xf7   :  { %v1893_v47 = vadd.f32 %v1381_v46, %v1380_v45  ;;  %v1383_v48 = vpop.f32.mrb[2].mxu0 }
  0xf8   :  { %v1384_v49 = vpop.f32.mrb[3].mxu0 }
  0xf9   :  { %v1895_v50 = vadd.f32 %v1384_v49, %v1383_v48 }
  0xfd   :  { %v1386_v51 = vpop.f32.mrb[4].mxu0 }
  0xfe   :  { %v1387_v52 = vpop.f32.mrb[5].mxu0 }
  0xff   :  { %v1897_v53 = vadd.f32 %v1387_v52, %v1386_v51  ;;  %v1389_v54 = vpop.f32.mrb[6].mxu0 }
 0x100   :  { %v1390_v55 = vpop.f32.mrb[7].mxu0 }
 0x101   :  { %v1899_v56 = vadd.f32 %v1390_v55, %v1389_v54  ;;  %v1693_v54 = vmov 1983009808  }
 0x102   :  { %v516_v55 = vunpack.c.l.s4 %v1693_v54 }
 0x105   :  { %v1392_v57 = vpop.f32.mrb[8].mxu0 }
 0x106   :  { %v1393_v58 = vpop.f32.mrb[9].mxu0 }
 0x107   :  { %v1901_v59 = vadd.f32 %v1393_v58, %v1392_v57  ;;  %v1395_v60 = vpop.f32.mrb[10].mxu0  ;;  %v518_v57 = vlaneseq }
 0x108   :  { %v1396_v61 = vpop.f32.mrb[11].mxu0 }
 0x109   :  { %v1903_v62 = vadd.f32 %v1396_v61, %v1395_v60 }
 0x10d   :  { %v1398_v63 = vpop.f32.mrb[12].mxu0 }
 0x10e   :  { %v1399_v0 = vpop.f32.mrb[13].mxu0 }
 0x10f   :  { %v1905_v1 = vadd.f32 %v1399_v0, %v1398_v63  ;;  %v1401_v2 = vpop.f32.mrb[14].mxu0  ;;  %v517_v63 = vunpack.c.0.s8 %v516_v55  ;;  %v519_v0 = vshrl.u32 %v518_v57, 7 }
 0x110   :  { %v1402_v3 = vpop.f32.mrb[15].mxu0 }
 0x111   :  { %v1403_v4 = vadd.f32 %v1402_v3, %v1401_v2  ;;  %v1939_v2 = vld [vmem:[%s2134_s2] ss:$0 sm:$0xff]  ;;  %s1694_s2 = smov 20  }
 0x113   :  { %v469_v5 = vmax.f32 %v1893_v47, %v1403_v4 }
 0x115   :  { %v1404_v6 = vpop.f32.mrb[16].mxu0 }
 0x116   :  { %v1405_v7 = vpop.f32.mrb[17].mxu0 }
 0x117   :  { %v1908_v8 = vadd.f32 %v1405_v7, %v1404_v6  ;;  %v1407_v9 = vpop.f32.mrb[18].mxu0 }
 0x118   :  { %v1408_v10 = vpop.f32.mrb[19].mxu0 }
 0x119   :  { %v470_v11 = vmax.f32 %v1895_v50, %v1908_v8  ;;  %v1912_v12 = vadd.f32 %v1408_v10, %v1407_v9  ;;  %v1942_v10 = vsub.s32 %v517_v63, %v519_v0  ;;  %v1626_v0 = vld [vmem:[%s2135_s3 + $0x8] sm:$0xff]  }
 0x11b   :  { %v471_v13 = vmax.f32 %v1897_v53, %v1912_v12 }
 0x11d   :  { %v1410_v14 = vpop.f32.mrb[20].mxu0 }
 0x11e   :  { %v1411_v15 = vpop.f32.mrb[21].mxu0 }
 0x11f   :  { %v1916_v16 = vadd.f32 %v1411_v15, %v1410_v14  ;;  %v1413_v17 = vpop.f32.mrb[22].mxu0 }
 0x120   :  { %v1414_v18 = vpop.f32.mrb[23].mxu0 }
 0x121   :  { %v472_v19 = vmax.f32 %v1899_v56, %v1916_v16  ;;  %v1920_v20 = vadd.f32 %v1414_v18, %v1413_v17 }
 0x123   :  { %v473_v21 = vmax.f32 %v1901_v59, %v1920_v20 }
 0x125   :  { %v1416_v22 = vpop.f32.mrb[24].mxu0 }
 0x126   :  { %v1417_v23 = vpop.f32.mrb[25].mxu0 }
 0x127   :  { %v1924_v24 = vadd.f32 %v1417_v23, %v1416_v22  ;;  %v1419_v25 = vpop.f32.mrb[26].mxu0 }
 0x128   :  { %v1420_v26 = vpop.f32.mrb[27].mxu0 }
 0x129   :  { %v474_v27 = vmax.f32 %v1903_v62, %v1924_v24  ;;  %v1928_v28 = vadd.f32 %v1420_v26, %v1419_v25  ;;  %v1623_v62 = vld [vmem:[%s2135_s3 + $0x40] sm:$0xff]  }
 0x12a   :  { %v1624_v24 = vld [vmem:[%s2135_s3] sm:$0xff]   ;;  %1464 = vmatprep.subr.bf16.mxu1 %v1623_v62 }
 0x12b   :  { %v475_v29 = vmax.f32 %v1905_v1, %v1928_v28  ;;  %1465 = vmatpush3.bf16.msra.mxu1 %v1624_v24 }
 0x12d   :  { %v1422_v30 = vpop.f32.mrb[28].mxu0 }
 0x12e   :  { %v1423_v31 = vpop.f32.mrb[29].mxu0 }
 0x12f   :  { %v1424_v32 = vadd.f32 %v1423_v31, %v1422_v30  ;;  %v1425_v33 = vpop.f32.mrb[30].mxu0 }
 0x130   :  { %v1426_v34 = vpop.f32.mrb[31].mxu0 }
 0x131   :  { %v1427_v35 = vadd.f32 %v1426_v34, %v1425_v33 }
 0x135   :  { %v1428_v36 = vpop.f32.mrb[32].mxu0 }
 0x136   :  { %v1429_v37 = vpop.f32.mrb[33].mxu0 }
 0x137   :  { %v1430_v38 = vadd.f32 %v1429_v37, %v1428_v36  ;;  %v1431_v39 = vpop.f32.mrb[34].mxu0 }
 0x138   :  { %v1432_v40 = vpop.f32.mrb[35].mxu0 }
 0x139   :  { %v1433_v41 = vadd.f32 %v1432_v40, %v1431_v39 }
 0x13d   :  { %v1434_v42 = vpop.f32.mrb[36].mxu0 }
 0x13e   :  { %v1435_v43 = vpop.f32.mrb[37].mxu0 }
 0x13f   :  { %v1436_v45 = vadd.f32 %v1435_v43, %v1434_v42  ;;  %v1437_v46 = vpop.f32.mrb[38].mxu0 }
 0x140   :  { %v1438_v47 = vpop.f32.mrb[39].mxu0 }
 0x141   :  { %v1932_v48 = vadd.f32 %v1438_v47, %v1437_v46 }
 0x145   :  { %v1440_v49 = vpop.f32.mrb[40].mxu0 }
 0x146   :  { %v1441_v50 = vpop.f32.mrb[41].mxu0 }
 0x147   :  { %v1934_v51 = vadd.f32 %v1441_v50, %v1440_v49  ;;  %v1443_v52 = vpop.f32.mrb[42].mxu0 }
 0x148   :  { %v1444_v58 = vpop.f32.mrb[43].mxu0 }
 0x149   :  { %v1445_v60 = vadd.f32 %v1444_v58, %v1443_v52 }
 0x14b   :  { %v476_v61 = vmax.f32 %v1424_v32, %v1445_v60 }
 0x14d   :  { %v483_v3 = vmax.f32 %v469_v5, %v476_v61  ;;  %v1446_v4 = vpop.f32.mrb[44].mxu0 }
 0x14e   :  { %v1447_v6 = vpop.f32.mrb[45].mxu0 }
 0x14f   :  { %v497_v7 = vadd.f32 %v1939_v2, %v483_v3  ;;  %v1448_v8 = vadd.f32 %v1447_v6, %v1446_v4  ;;  %v1449_v9 = vpop.f32.mrb[46].mxu0 }
 0x150   :  { %v1450_v14 = vpop.f32.mrb[47].mxu0 }
 0x151   :  { %v477_v15 = vmax.f32 %v1427_v35, %v1448_v8  ;;  %v1451_v17 = vadd.f32 %v1450_v14, %v1449_v9  ;;  %v504_v18 = vmax.f32 %v497_v7, 0.0  ;;  %v1627_v7 = vld [vmem:[%s2135_s3 + $0x50] sm:$0xff]  }
 0x152   :  { %v1628_v8 = vld [vmem:[%s2135_s3 + $0x10] sm:$0xff]  }
 0x153   :  { %v484_v22 = vmax.f32 %v470_v11, %v477_v15  ;;  %v478_v23 = vmax.f32 %v1430_v38, %v1451_v17  ;;  %v521_v25 = vrot.slane %v504_v18, %v1942_v10  ;;  %v528_v26 = vcombine.high %v504_v18, %v504_v18  ;;  %513 = vst.msk [vmem:[#allocation2] sm:$0x3] %vm512_vm0, %v504_v18  ;;  %v1629_v17 = vld [vmem:[%s2135_s3 + $0x58] sm:$0xff]  }
 0x154   :  { %v1630_v18 = vld [vmem:[%s2135_s3 + $0x18] sm:$0xff]   ;;  %vm643_vm0 = vcmask 27650  }
 0x155   :  { %v498_v5 = vadd.f32 %v1939_v2, %v484_v22  ;;  %v485_v30 = vmax.f32 %v471_v13, %v478_v23  ;;  %v1452_v31 = vpop.f32.mrb[48].mxu0  ;;  %v522_v32 = vcombine.high %v521_v25, %v521_v25  ;;  %v535_v33 = vrot.slane %v528_v26, %v1942_v10  ;;  %v1631_v26 = vld [vmem:[%s2135_s3 + $0x60] sm:$0xff]  }
 0x156   :  { %v1453_v34 = vpop.f32.mrb[49].mxu0 }
 0x157   :  { %v505_v35 = vmax.f32 %v498_v5, 0.0  ;;  %v1454_v36 = vadd.f32 %v1453_v34, %v1452_v31  ;;  %v1455_v37 = vpop.f32.mrb[50].mxu0  ;;  %523 = vrot.lane.b32.xlu0 %v522_v32, %s1694_s2  ;;  %v541_v11 = vcombine.high %v535_v33, %v535_v33  ;;  %v499_v38 = vadd.f32 %v1939_v2, %v485_v30  ;;  %v1632_v5 = vld [vmem:[%s2135_s3 + $0x20] sm:$0xff]   ;;  %v1633_v31 = vld [vmem:[%s2135_s3 + $0x68] sm:$0xff]  }
 0x158   :  { %v1456_v39 = vpop.f32.mrb[51].mxu0  ;;  %v1634_v32 = vld [vmem:[%s2135_s3 + $0x28] sm:$0xff]  }
 0x159   :  { %v479_v40 = vmax.f32 %v1433_v41, %v1454_v36  ;;  %v1457_v42 = vadd.f32 %v1456_v39, %v1455_v37  ;;  %542 = vrot.lane.b32.xlu1 %v541_v11, %s1695_s19  ;;  %v566_v53 = vcombine.high %v505_v35, %v505_v35  ;;  %v554_v12 = vrot.slane %v505_v35, %v1942_v10  ;;  %v1635_v36 = vld [vmem:[%s2135_s3 + $0x70] sm:$0xff]   ;;  %s1715_s19 = smov 56  }
 0x15a   :  { %v506_v47 = vmax.f32 %v499_v38, 0.0  ;;  %v1636_v11 = vld [vmem:[%s2135_s3 + $0x30] sm:$0xff]  }
 0x15b   :  { %v486_v13 = vmax.f32 %v472_v19, %v479_v40  ;;  %v480_v43 = vmax.f32 %v1436_v45, %v1457_v42  ;;  %536 = vrot.lane.b32.xlu0 %v535_v33, %s1696_s1  ;;  %v573_v46 = vrot.slane %v566_v53, %v1942_v10  ;;  %v560_v56 = vcombine.high %v554_v12, %v554_v12  ;;  %v1637_v40 = vld [vmem:[%s2135_s3 + $0x78] sm:$0xff]   ;;  %s1716_s1 = smov 76  }
 0x15c   :  { %v609_v16 = vcombine.high %v506_v47, %v506_v47  ;;  %v597_v45 = vrot.slane %v506_v47, %v1942_v10 }
 0x15d   :  { %v487_v41 = vmax.f32 %v473_v21, %v480_v43  ;;  %v1458_v49 = vpop.f32.mrb[52].mxu0  ;;  %574 = vrot.lane.b32.xlu1 %v573_v46, %s1697_s20  ;;  %v584_v59 = vcombine.high %v573_v46, %v573_v46  ;;  %v500_v20 = vadd.f32 %v1939_v2, %v486_v13  ;;  %s1717_s20 = smov 96   ;;  %v1640_v13 = vld [vmem:[%s2135_s3 + $0xc0] sm:$0xff]  }
 0x15e   :  { %v1459_v50 = vpop.f32.mrb[53].mxu0  ;;  %v616_v60 = vrot.slane %v609_v16, %v1942_v10  ;;  %v603_v61 = vcombine.high %v597_v45, %v597_v45 }
 0x15f   :  { %v1460_v52 = vadd.f32 %v1459_v50, %v1458_v49  ;;  %v1461_v54 = vpop.f32.mrb[54].mxu0  ;;  %555 = vrot.lane.b32.xlu0 %v554_v12, %s1698_s21  ;;  %v507_v63 = vmax.f32 %v500_v20, 0.0  ;;  %s1708_s21 = smov 44  }
 0x160   :  { %v1462_v19 = vpop.f32.mrb[55].mxu0 }
 0x161   :  { %v481_v55 = vmax.f32 %v1932_v48, %v1460_v52  ;;  %v1463_v57 = vadd.f32 %v1462_v19, %v1461_v54  ;;  %561 = vrot.lane.b32.xlu1 %v560_v56, %s1699_s22  ;;  %v635_v1 = vrot.slane %v507_v63, %v1942_v10  ;;  %v652_v28 = vcombine.high %v507_v63, %v507_v63  ;;  %s1709_s22 = smov 64  }
 0x163   :  { %v488_v21 = vmax.f32 %v474_v27, %v481_v55  ;;  %v482_v58 = vmax.f32 %v1934_v51, %v1463_v57  ;;  %585 = vrot.lane.b32.xlu0 %v584_v59, %s1700_s23  ;;  %v622_v27 = vcombine.high %v616_v60, %v616_v60  ;;  %v1625_v51 = vld [vmem:[%s2135_s3 + $0x48] sm:$0xff]   ;;  %v646_v3 = vcombine.high %v635_v1, %v635_v1 }
 0x164   :  { %1466 = vmatprep.subr.bf16.mxu1 %v1625_v51  ;;  %v659_v4 = vrot.slane %v652_v28, %v1942_v10 }
 0x165   :  { %v1970_v48 = vmax.f32 %v475_v29, %v482_v58  ;;  %598 = vrot.lane.b32.xlu1 %v597_v45, %s1701_s24  ;;  %v501_v29 = vadd.f32 %v1939_v2, %v487_v41  ;;  %1467 = vmatpush3.bf16.msra.mxu1 %v1626_v0  ;;  %v502_v15 = vadd.f32 %v1939_v2, %v488_v21 }
 0x166   :  { %1468 = vmatprep.subr.bf16.mxu1 %v1627_v7  ;;  %v665_v9 = vcombine.high %v659_v4, %v659_v4 }
 0x167   :  { %604 = vrot.lane.b32.xlu0 %v603_v61, %s1702_s29  ;;  %v508_v6 = vmax.f32 %v501_v29, 0.0  ;;  %v509_v25 = vmax.f32 %v502_v15, 0.0  ;;  %v503_v37 = vadd.f32 %v1939_v2, %v1970_v48  ;;  %v1638_v2 = vld [vmem:[%s2135_s3 + $0x38] sm:$0xff]  }
 0x169   :  { %623 = vrot.lane.b32.xlu1 %v622_v27, %s1703_s30  ;;  %1469 = vmatpush3.bf16.msra.mxu1 %v1628_v8  ;;  %v690_v14 = vcombine.high %v508_v6, %v508_v6  ;;  %v678_v22 = vrot.slane %v508_v6, %v1942_v10  ;;  %v721_v34 = vrot.slane %v509_v25, %v1942_v10  ;;  %v510_v42 = vmax.f32 %v503_v37, 0.0  ;;  %v1655_v37 = vld [vmem:[%s2135_s3 + $0xb8] sm:$0xff]  }
 0x16a   :  { %1470 = vmatprep.subr.bf16.mxu1 %v1629_v17  ;;  %v733_v35 = vcombine.high %v509_v25, %v509_v25  ;;  %v1645_v25 = vld [vmem:[%s2135_s3 + $0x90] sm:$0xff]  }
 0x16b   :  { %617 = vrot.lane.b32.xlu0 %v616_v60, %s1704_s12  ;;  %v697_v23 = vrot.slane %v690_v14, %v1942_v10  ;;  %v684_v30 = vcombine.high %v678_v22, %v678_v22  ;;  %s1712_s12 = smov 124   ;;  %v727_v38 = vcombine.high %v721_v34, %v721_v34  ;;  %v759_v12 = vrot.slane %v510_v42, %v1942_v10  ;;  %v1641_v14 = vld [vmem:[%s2135_s3 + $0x80] sm:$0xff]   ;;  %v1659_v42 = vld [vmem:[%s2137_s5 + $0x18] sm:$0xff]  }
 0x16c   :  { %v740_v39 = vrot.slane %v733_v35, %v1942_v10  ;;  %v1653_v35 = vld [vmem:[%s2135_s3 + $0xb0] sm:$0xff]  }
 0x16d   :  { %636 = vrot.lane.b32.xlu1 %v635_v1, %s1705_s13  ;;  %1471 = vmatpush3.bf16.msra.mxu1 %v1630_v18  ;;  %v703_v33 = vcombine.high %v697_v23, %v697_v23  ;;  %v1642_v18 = vld [vmem:[%s2135_s3 + $0xc8] sm:$0xff]  }
 0x16e   :  { %1472 = vmatprep.subr.bf16.mxu1 %v1631_v26  ;;  %v746_v53 = vcombine.high %v740_v39, %v740_v39  ;;  %v1646_v26 = vld [vmem:[%s2135_s3 + $0xd8] sm:$0xff]  }
 0x16f   :  { %647 = vrot.lane.b32.xlu0 %v646_v3, %s1706_s0  ;;  %s1714_s0 = smov 36  }
 0x171   :  { %660 = vrot.lane.b32.xlu1 %v659_v4, %s1707_s18  ;;  %1473 = vmatpush3.bf16.msra.mxu1 %v1632_v5  ;;  %v1647_v5 = vld [vmem:[%s2135_s3 + $0x98] sm:$0xff]  }
 0x172   :  { %1474 = vmatprep.subr.bf16.mxu1 %v1633_v31  ;;  %v1649_v31 = vld [vmem:[%s2135_s3 + $0xa0] sm:$0xff]  }
 0x173   :  { %666 = vrot.lane.b32.xlu0 %v665_v9, %s1708_s21 }
 0x175   :  { %679 = vrot.lane.b32.xlu1 %v678_v22, %s1709_s22  ;;  %1475 = vmatpush3.bf16.msra.mxu1 %v1634_v32  ;;  %v1650_v32 = vld [vmem:[%s2135_s3 + $0xe8] sm:$0xff]  }
 0x176   :  { %1476 = vmatprep.subr.bf16.mxu1 %v1635_v36  ;;  %v1654_v36 = vld [vmem:[%s2135_s3 + $0xf8] sm:$0xff]  }
 0x177   :  { %698 = vrot.lane.b32.xlu0 %v697_v23, %s1710_s27  ;;  %v1644_v23 = vld [vmem:[%s2135_s3 + $0xd0] sm:$0xff]  }
 0x179   :  { %685 = vrot.lane.b32.xlu1 %v684_v30, %s1711_s9  ;;  %1477 = vmatpush3.bf16.msra.mxu1 %v1636_v11  ;;  %v1648_v30 = vld [vmem:[%s2135_s3 + $0xe0] sm:$0xff]  }
 0x17a   :  { %1478 = vmatprep.subr.bf16.mxu1 %v1637_v40  ;;  %v1658_v40 = vld [vmem:[%s2137_s5 + $0x10] sm:$0xff]  }
 0x17b   :  { %704 = vrot.lane.b32.xlu0 %v703_v33, %s1712_s12  ;;  %v1651_v33 = vld [vmem:[%s2135_s3 + $0xa8] sm:$0xff]  }
 0x17d   :  { %722 = vrot.lane.b32.xlu1 %v721_v34, %s1713_s15  ;;  %1479 = vmatpush3.bf16.msra.mxu1 %v1638_v2  ;;  %v1652_v34 = vld [vmem:[%s2135_s3 + $0xf0] sm:$0xff]   ;;  %v1660_v2 = vld [vmem:[%s2137_s5 + $0x20] sm:$0xff]  }
 0x17e   :  { %1486 = vmatprep.subr.bf16.mxu1 %v1640_v13  ;;  %v1663_v13 = vld [vmem:[%s2137_s5 + $0x38] sm:$0xff]  }
 0x17f   :  { %728 = vrot.lane.b32.xlu0 %v727_v38, %s1714_s0  ;;  %v1656_v38 = vld [vmem:[%s2137_s5] sm:$0xff]  }
 0x181   :  { %741 = vrot.lane.b32.xlu1 %v740_v39, %s1715_s19  ;;  %v1657_v39 = vld [vmem:[%s2137_s5 + $0x8] sm:$0xff]  }
 0x183   :  { %747 = vrot.lane.b32.xlu0 %v746_v53, %s1716_s1  ;;  %v1661_v53 = vld [vmem:[%s2137_s5 + $0x28] sm:$0xff]  }
 0x185   :  { %760 = vrot.lane.b32.xlu1 %v759_v12, %s1717_s20  ;;  %v1662_v12 = vld [vmem:[%s2137_s5 + $0x30] sm:$0xff]  }
 0x1c9   :  { %v524_v43 = vpop.permute.xlu0 %523 }
 0x1ca   :  { %527 = vst.msk [vmem:[#allocation2] sm:$0x3] %vm526_vm1, %v524_v43  ;;  %vm639_vm1 = vcmask 916480  }
 0x1cb   :  { %v543_v46 = vpop.permute.xlu1 %542 }
 0x1cd   :  { %v537_v47 = vpop.permute.xlu0 %536 }
 0x1ce   :  { %540 = vst.msk [vmem:[#allocation2] sm:$0x3] %vm539_vm2, %v537_v47  ;;  %vm644_vm2 = vmor %vm643_vm0, %vm642_vm15  ;;  %vm744_vm15 = vcmask 615872   ;;  %vm750_vm0 = vcmask 779872  }
 0x1cf   :  { %v575_v41 = vpop.permute.xlu1 %574  ;;  %546 = vst.msk [vmem:[#allocation2] sm:$0x3] %vm545_vm3, %v543_v46  ;;  %vm650_vm3 = vcmask 189472  }
 0x1d0   :  { %v576_v49 = vrot.slane %v575_v41, 6 }
 0x1d1   :  { %v556_v50 = vpop.permute.xlu0 %555 }
 0x1d2   :  { %559 = vst.msk [vmem:[#allocation2] sm:$0x3] %vm558_vm4, %v556_v50  ;;  %v578_v54 = vsel %vm577_vm7, %v576_v49, %v575_v41  ;;  %vm663_vm4 = vcmask 353472   ;;  %vm688_vm7 = vcmask 845472   ;;  %v1322_v50 = vld [vmem:[%s2136_s4] ss:$0 sm:$0xff] }
 0x1d3   :  { %v562_v52 = vpop.permute.xlu1 %561  ;;  %s1719_s4 = smov [#allocation3]  }
 0x1d4   :  { %565 = vst.msk [vmem:[#allocation2] sm:$0x3] %vm564_vm8, %v562_v52  ;;  %vm701_vm8 = vcmask 1009472  }
 0x1d5   :  { %v586_v56 = vpop.permute.xlu0 %585  ;;  %583 = vst.msk [vmem:[#allocation2] sm:$0xf] %vm582_vm9, %v578_v54  ;;  %vm710_vm9 = vcmask 1042400  }
 0x1d6   :  { %589 = vst.msk [vmem:[#allocation2 + $0x2] sm:$0x3] %vm588_vm10, %v586_v56  ;;  %vm711_vm10 = vcmask 125954  }
 0x1d7   :  { %v599_v16 = vpop.permute.xlu1 %598 }
 0x1d8   :  { %602 = vst.msk [vmem:[#allocation2 + $0x2] sm:$0x3] %vm601_vm11, %v599_v16  ;;  %vm707_vm11 = vcmask 1014784  }
 0x1d9   :  { %v605_v19 = vpop.permute.xlu0 %604 }
 0x1da   :  { %608 = vst.msk [vmem:[#allocation2 + $0x2] sm:$0x3] %vm607_vm12, %v605_v19  ;;  %vm712_vm12 = vmor %vm711_vm10, %vm710_vm9 }
 0x1db   :  { %v624_v45 = vpop.permute.xlu1 %623 }
 0x1dd   :  { %v618_v55 = vpop.permute.xlu0 %617 }
 0x1de   :  { %621 = vst.msk [vmem:[#allocation2 + $0x2] sm:$0x3] %vm620_vm13, %v618_v55  ;;  %vm725_vm13 = vcmask 287872  }
 0x1df   :  { %627 = vst.msk [vmem:[#allocation2 + $0x2] sm:$0x3] %vm626_vm14, %v624_v45  ;;  %v637_v57 = vpop.permute.xlu1 %636  ;;  %vm731_vm14 = vcmask 451872  }
 0x1e0   :  { %v638_v59 = vrot.slane %v637_v57, 6 }
 0x1e1   :  { %v648_v20 = vpop.permute.xlu0 %647 }
 0x1e2   :  { %v640_v21 = vsel %vm639_vm1, %v638_v59, %v637_v57  ;;  %vm763_vm1 = vcmask 943872  }
 0x1e3   :  { %645 = vst.msk [vmem:[#allocation2 + $0x2] sm:$0xf] %vm644_vm2, %v640_v21  ;;  %v661_v58 = vpop.permute.xlu1 %660  ;;  %vm1718_vm2 = vmmov 0  }
 0x1e4   :  { %651 = vst.msk [vmem:[#allocation2 + $0x4] sm:$0x3] %vm650_vm3, %v648_v20  ;;  %vm1248_vm3 = vcmask 1041408  }
 0x1e5   :  { %664 = vst.msk [vmem:[#allocation2 + $0x4] sm:$0x3] %vm663_vm4, %v661_v58  ;;  %v667_v60 = vpop.permute.xlu0 %666 }
 0x1e6   :  { %670 = vst.msk [vmem:[#allocation2 + $0x4] sm:$0x3] %vm669_vm5, %v667_v60 }
 0x1e7   :  { %v680_v48 = vpop.permute.xlu1 %679 }
 0x1e8   :  { %683 = vst.msk [vmem:[#allocation2 + $0x4] sm:$0x3] %vm682_vm6, %v680_v48 }
 0x1e9   :  { %v699_v61 = vpop.permute.xlu0 %698 }
 0x1eb   :  { %v686_v63 = vpop.permute.xlu1 %685 }
 0x1ec   :  { %689 = vst.msk [vmem:[#allocation2 + $0x4] sm:$0x3] %vm688_vm7, %v686_v63 }
 0x1ed   :  { %702 = vst.msk [vmem:[#allocation2 + $0x4] sm:$0x3] %vm701_vm8, %v699_v61  ;;  %v705_v62 = vpop.permute.xlu0 %704 }
 0x1ee   :  { %v706_v24 = vrot.slane %v705_v62, 6 }
 0x1ef   :  { %v723_v27 = vpop.permute.xlu1 %722 }
 0x1f0   :  { %v708_v1 = vsel %vm707_vm11, %v706_v24, %v705_v62 }
 0x1f1   :  { %713 = vst.msk [vmem:[#allocation2 + $0x4] sm:$0xf] %vm712_vm12, %v708_v1  ;;  %v729_v28 = vpop.permute.xlu0 %728 }
 0x1f2   :  { %726 = vst.msk [vmem:[#allocation2 + $0x6] sm:$0x3] %vm725_vm13, %v723_v27 }
 0x1f3   :  { %732 = vst.msk [vmem:[#allocation2 + $0x6] sm:$0x3] %vm731_vm14, %v729_v28  ;;  %v742_v29 = vpop.permute.xlu1 %741 }
 0x1f4   :  { %745 = vst.msk [vmem:[#allocation2 + $0x6] sm:$0x3] %vm744_vm15, %v742_v29 }
 0x1f5   :  { %v748_v51 = vpop.permute.xlu0 %747 }
 0x1f6   :  { %751 = vst.msk [vmem:[#allocation2 + $0x6] sm:$0x3] %vm750_vm0, %v748_v51 }
 0x1f7   :  { %v761_v0 = vpop.permute.xlu1 %760 }
 0x1f8   :  { %764 = vst.msk [vmem:[#allocation2 + $0x6] sm:$0x3] %vm763_vm1, %v761_v0 }
 0x1ff   :  { %v765_v3 = vld [vmem:[#allocation2] sm:$0xff] }
 0x200   :  { %v767_v4 = vcombine.high %v765_v3, %v765_v3  ;;  %v774_v6 = vrot.slane %v765_v3, %v1942_v10 }
 0x202   :  { %v782_v7 = vcombine.high %v774_v6, %v774_v6  ;;  %v781_v8 = vrot.slane %v767_v4, %v1942_v10  ;;  %v788_v17 = vpack.c.bf16 %v774_v6, %v774_v6  ;;  %v1643_v10 = vld [vmem:[%s2135_s3 + $0x88] sm:$0xff]  }
 0x204   :  { %v789_v9 = vpack.c.bf16 %v782_v7, %v782_v7  ;;  %v783_v15 = vcombine.high %v781_v8, %v781_v8  ;;  %v790_v11 = vpack.c.bf16 %v781_v8, %v781_v8 }
 0x206   :  { %1087 = vmatprep.mubr.bf16.mxu1 %v789_v9  ;;  %v791_v22 = vpack.c.bf16 %v783_v15, %v783_v15 }
 0x207   :  { %1088 = vmatmul.mubr.bf16.vlgmr.msra.gmra.mrb[0].mxu1 %v788_v17 }
 0x208   :  { %1487 = vmatpush3.bf16.msra.mxu1 %v1641_v14  ;;  %1127 = vmatprep.mubr.bf16.mxu1 %v791_v22 }
 0x209   :  { %1488 = vmatprep.subr.bf16.mxu1 %v1642_v18 }
 0x20c   :  { %1489 = vmatpush3.bf16.msra.mxu1 %v1643_v10 }
 0x20d   :  { %1490 = vmatprep.subr.bf16.mxu1 %v1644_v23 }
 0x210   :  { %1491 = vmatpush3.bf16.msra.mxu1 %v1645_v25 }
 0x211   :  { %1492 = vmatprep.subr.bf16.mxu1 %v1646_v26 }
 0x214   :  { %1493 = vmatpush3.bf16.msra.mxu1 %v1647_v5 }
 0x215   :  { %1494 = vmatprep.subr.bf16.mxu1 %v1648_v30 }
 0x218   :  { %1495 = vmatpush3.bf16.msra.mxu1 %v1649_v31 }
 0x219   :  { %1496 = vmatprep.subr.bf16.mxu1 %v1650_v32 }
 0x21c   :  { %1497 = vmatpush3.bf16.msra.mxu1 %v1651_v33 }
 0x21d   :  { %1498 = vmatprep.subr.bf16.mxu1 %v1652_v34 }
 0x220   :  { %1499 = vmatpush3.bf16.msra.mxu1 %v1653_v35 }
 0x221   :  { %1500 = vmatprep.subr.bf16.mxu1 %v1654_v36 }
 0x224   :  { %1501 = vmatpush3.bf16.msra.mxu1 %v1655_v37 }
 0x225   :  { %1517 = vmatprep.subr.bf16.mxu1 %v1692_v44 }
 0x227   :  { %1128 = vmatmul.mubr.bf16.vlgmr.msra.gmra.mrb[4].mxu1 %v790_v11 }
 0x228   :  { %1518 = vmatpush3.bf16.msra.mxu1 %v1656_v38  ;;  %1533 = vmatprep.mubr.msk.bf16.mxu1 %vm1718_vm2, %v1692_v44 }
 0x229   :  { %1519 = vmatprep.subr.bf16.mxu1 %v1692_v44 }
 0x22c   :  { %1520 = vmatpush3.bf16.msra.mxu1 %v1657_v39 }
 0x22d   :  { %1521 = vmatprep.subr.bf16.mxu1 %v1692_v44 }
 0x230   :  { %1522 = vmatpush3.bf16.msra.mxu1 %v1658_v40 }
 0x231   :  { %1523 = vmatprep.subr.bf16.mxu1 %v1692_v44 }
 0x234   :  { %1524 = vmatpush3.bf16.msra.mxu1 %v1659_v42 }
 0x235   :  { %1525 = vmatprep.subr.bf16.mxu1 %v1692_v44 }
 0x238   :  { %1526 = vmatpush3.bf16.msra.mxu1 %v1660_v2 }
 0x239   :  { %1527 = vmatprep.subr.bf16.mxu1 %v1692_v44 }
 0x23c   :  { %1528 = vmatpush3.bf16.msra.mxu1 %v1661_v53 }
 0x23d   :  { %1529 = vmatprep.subr.bf16.mxu1 %v1692_v44 }
 0x240   :  { %1530 = vmatpush3.bf16.msra.mxu1 %v1662_v12 }
 0x241   :  { %1531 = vmatprep.subr.bf16.mxu1 %v1692_v44  ;;  %v1355_v44 = vld [vmem:[%s2138_s6] ss:$0 sm:$0xff]  ;;  %s1269_s6 = sshll.u32 %s1719_s4, 4  ;;  %s1270_s6 = int_to_ptr.vmem [resolvable:$true] %s1269_s6 }
 0x242   :  { %s1668_s1 = scalar_lea.vmem %s1270_s6, 32  ;;  %p1673_p1 = scmp.lt.s32.totalorder %s1270_s6, %s1270_s6 }
 0x243   :  { %p1669_p0 = scmp.ne.s32.totalorder %s1270_s6, %s1668_s1  ;;  %p1674_p2 = scmp.lt.s32.totalorder %s1668_s1, %s1668_s1 }
 0x244   :  { %1532 = vmatpush3.bf16.msra.mxu1 %v1663_v13 }
 0x245   :  { %p1675_p3 = por %p1674_p2, %p1673_p1 }
 0x247   :  { %p1676_p4 = pnand %p1675_p3, %p1669_p0 }
 0x2da   :  { %v1480_v43 = vpop.f32.mrb[0].mxu1 }
 0x2db   :  { %v1481_v46 = vpop.f32.mrb[1].mxu1 }
 0x2dc   :  { %v1482_v47 = vadd.f32 %v1481_v46, %v1480_v43  ;;  %v1483_v41 = vpop.f32.mrb[2].mxu1 }
 0x2dd   :  { %v1484_v49 = vpop.f32.mrb[3].mxu1 }
 0x2de   :  { %v1090_v56 = vadd.f32 %v1482_v47, %v1322_v50 }
 0x2fa   :  { %v1502_v52 = vpop.f32.mrb[4].mxu1 }
 0x2fb   :  { %v1503_v54 = vpop.f32.mrb[5].mxu1 }
 0x2fc   :  { %v1504_v16 = vadd.f32 %v1503_v54, %v1502_v52  ;;  %v1505_v19 = vpop.f32.mrb[6].mxu1 }
 0x2fd   :  { %v1506_v45 = vpop.f32.mrb[7].mxu1 }
 0x2fe   :  { %v1130_v55 = vadd.f32 %v1504_v16, %v1090_v56 }
 0x300   :  { %v1135_v57 = vmax.f32 %v1130_v55, 0.0 }
 0x302   :  { %v1136_v59 = vpack.c.bf16 %v1135_v57, %v1135_v57 }
 0x304   :  { %1534 = vmatmul.mubr.bf16.vlgmr.msra.gmra.mrb[8].mxu1 %v1136_v59 }
 0x3d7   :  { %v1242_v20 = vpop.f32.mrb[8].mxu1 }
 0x3d8   :  { %v1243_v21 = vadd.f32 %v1355_v44, %v1242_v20  ;;  %v1535_v58 = vpop.f32.mrb[9].mxu1 }
 0x3d9   :  { %v1245_v60 = vpop.f32.mrb[10].mxu1 }
 0x3da   :  { %v1536_v48 = vpop.f32.mrb[11].mxu1  ;;  %v1249_v61 = vsel %vm1248_vm3, %v1243_v21, -inf }
 0x3db   :  { %1250 = vmax.xlane.f32.xlu0 %v1249_v61 }
 0x468   :  { %v1251_v63 = vpop.xlane.xlu0 %1250 }
 0x469   :  { %v1252_v62 = vsub.f32 %v1243_v21, %v1251_v63 }
 0x46b   :  { %v1253_v24 = vmul.f32 1.442695, %v1252_v62 }
 0x46d   :  { %1664 = vpow2.f32 %v1253_v24 }
 0x477   :  { %v1665_v27 = vpop.eup %1664 }
 0x478   :  { %v1255_v1 = vsel %vm1248_vm3, %v1665_v27, 0.0 }
 0x479   :  { %1256 = vadd.xlane.f32.xlu1 %v1255_v1 }
 0x506   :  { %v1257_v28 = vpop.xlane.xlu1 %1256 }
 0x507   :  { %1666 = vlog2.f32 %v1257_v28 }
 0x511   :  { %v1667_v29 = vpop.eup %1666 }
 0x512   :  { %v1259_v51 = vmul.f32 0.6931472, %v1667_v29 }
 0x514   :  { %v1260_v0 = vadd.f32 %v1259_v51, %v1251_v63 }
 0x516   :  { %v1261_v3 = vsub.f32 %v1243_v21, %v1260_v0 }
 0x518   :  { %1262 = vst [vmem:[#allocation3] sm:$0x3] %v1261_v3 }
 0x519   :  { %1679 = shalt.err (!%p1676_p4)
}
 0x51a   :  { %s1680_s22 = scalar_lea.hbm %s2139_s7, 32 }
 0x51b   :  { %p1681_p5 = scmp.ne.s32.totalorder %s2139_s7, %s1680_s22  ;;  %p1684_p6 = scmp.lt.u32.totalorder %s1680_s22, %s2139_s7 }
 0x51d   :  { %p1686_p7 = pnand %p1684_p6, %p1681_p5 }
 0x51f   :  { %1689 = shalt.err (!%p1686_p7)
}
 0x520   :  { %1272 = dma.vmem_to_hbm [thread:$0]  %s1270_s6, 32, %s2139_s7, [#allocation4]  }
 0x521   :  { %1690 = dma.done.wait [#allocation4], 32  }
 0x522   :  { %1691 = vsyncadd [#allocation4], 4294967264 }
 0x523   :  { %1276 = vsyncpa [#allocation4], 1 }

</bundles_post_ra>
